<compile_context>
chip_gen: v7x
topology: tpu7x:2x2x1
jax: 0.10.0
libtpu: 0.0.40
codegen_flags: <defaults>
</compile_context>

<pallas_src>
import functools

import jax
import jax.numpy as jnp
from jax.experimental import pallas as pl
from jax.experimental.pallas import tpu as pltpu


# ----------------------------- small helpers ------------------------------


def _layernorm(x, g, b, eps):
    mu = jnp.mean(x, axis=-1, keepdims=True)
    xc = x - mu
    var = jnp.mean(xc * xc, axis=-1, keepdims=True)
    return xc * jax.lax.rsqrt(var + eps) * g + b


# ----------------------------- patch-embed linear ------------------------------


def _linear_kernel(x_ref, w_ref, b_ref, o_ref):
    y = jnp.dot(x_ref[...].astype(jnp.bfloat16), w_ref[...],
                preferred_element_type=jnp.float32)
    o_ref[...] = (y + b_ref[...]).astype(o_ref.dtype)


def linear(x, w_bf16, b, *, tm=128):
    """x: (M, K) f32 @ w: (K, N) bf16 + b: (N,) -> (M, N) f32, tiled over rows."""
    M, K = x.shape
    N = w_bf16.shape[1]
    tm = min(tm, M)
    return pl.pallas_call(
        _linear_kernel,
        out_shape=jax.ShapeDtypeStruct((M, N), jnp.float32),
        grid=(pl.cdiv(M, tm),),
        in_specs=[
            pl.BlockSpec((tm, K), lambda i: (i, 0)),
            pl.BlockSpec((K, N), lambda i: (0, 0)),
            pl.BlockSpec((1, N), lambda i: (0, 0)),
        ],
        out_specs=pl.BlockSpec((tm, N), lambda i: (i, 0)),
        compiler_params=pltpu.CompilerParams(dimension_semantics=("parallel",)),
    )(x, w_bf16, b.reshape(1, N))


# ----------------------------- fused transformer stack ------------------------------


def _vit_blocks_kernel(tok_ref, pos_ref,
                       ln1_g, ln1_b, qkv_w, qkv_b, proj_w, proj_b,
                       ln2_g, ln2_b, fc1_w, fc1_b, fc2_w, fc2_b,
                       out_ref, *, num_heads, eps):
    d = pl.program_id(1)

    # First block of this batch element: load tokens + fused pos_embed add
    # (pos_drop = identity in eval). Tokens then stay resident in the output
    # VMEM block across the whole depth loop.
    @pl.when(d == 0)
    def _():
        out_ref[0] = tok_ref[0] + pos_ref[0]

    tok = out_ref[0]                                   # (N, D) f32
    N, D = tok.shape
    dh = D // num_heads
    scale = dh ** -0.5

    # ---- attention branch: LN1 -> fused QKV matmul -> per-head SDPA ----
    x = _layernorm(tok, ln1_g[0], ln1_b[0], eps)
    qkv = jnp.dot(x.astype(jnp.bfloat16), qkv_w[0],
                  preferred_element_type=jnp.float32) + qkv_b[0]      # (N, 3D) f32
    pw = proj_w[0]                                                     # (D, D) bf16

    attn = jnp.zeros((N, D), jnp.float32)
    for h in range(num_heads):
        q = (qkv[:, h * dh:(h + 1) * dh] * scale).astype(jnp.bfloat16)          # scale folded into q
        k = qkv[:, D + h * dh:D + (h + 1) * dh].astype(jnp.bfloat16)
        v = qkv[:, 2 * D + h * dh:2 * D + (h + 1) * dh].astype(jnp.bfloat16)
        s = jax.lax.dot_general(q, k, (((1,), (1,)), ((), ())),
                                preferred_element_type=jnp.float32)              # (N, N)
        m = jnp.max(s, axis=-1, keepdims=True)
        p = jnp.exp(s - m)
        p = p * pl.reciprocal(jnp.sum(p, axis=-1, keepdims=True), approx=True)
        o_h = jnp.dot(p.astype(jnp.bfloat16), v,
                      preferred_element_type=jnp.float32)                        # (N, dh)
        # Head merge fused into output projection: concat_h(o_h) @ Wp == sum_h o_h @ Wp[h*dh:(h+1)*dh]
        attn = attn + jnp.dot(o_h.astype(jnp.bfloat16), pw[h * dh:(h + 1) * dh, :],
                              preferred_element_type=jnp.float32)
    tok = tok + attn + proj_b[0]                       # residual (drop_path = identity, eval)

    # ---- MLP branch: LN2 -> fc1 + GELU -> fc2 -> residual ----
    x = _layernorm(tok, ln2_g[0], ln2_b[0], eps)
    h1 = jnp.dot(x.astype(jnp.bfloat16), fc1_w[0],
                 preferred_element_type=jnp.float32) + fc1_b[0]
    h1 = jax.nn.gelu(h1)   # TODO(synk): tanh approximation vs PyTorch exact-erf GELU
    h2 = jnp.dot(h1.astype(jnp.bfloat16), fc2_w[0],
                 preferred_element_type=jnp.float32) + fc2_b[0]
    out_ref[0] = tok + h2


def vit_blocks(tok, pos, blk, *, num_heads, eps=1e-6):
    """tok: (B, N, D) f32; pos: (1, N, D); blk: dict of depth-stacked block params."""
    B, N, D = tok.shape
    depth = blk["qkv_w"].shape[0]
    Dm = blk["fc1_w"].shape[-1]
    kern = functools.partial(_vit_blocks_kernel, num_heads=num_heads, eps=eps)

    def vec_spec(n):   # per-block 1D params, stacked to (depth, 1, n)
        return pl.BlockSpec((1, 1, n), lambda b, d: (d, 0, 0))

    def mat_spec(k, n):  # per-block matrices, stacked to (depth, k, n)
        return pl.BlockSpec((1, k, n), lambda b, d: (d, 0, 0))

    return pl.pallas_call(
        kern,
        out_shape=jax.ShapeDtypeStruct((B, N, D), jnp.float32),
        grid=(B, depth),
        in_specs=[
            pl.BlockSpec((1, N, D), lambda b, d: (b, 0, 0)),   # tokens (fetched once per b)
            pl.BlockSpec((1, N, D), lambda b, d: (0, 0, 0)),   # pos embed
            vec_spec(D), vec_spec(D),                          # ln1 gamma/beta
            mat_spec(D, 3 * D), vec_spec(3 * D),               # qkv
            mat_spec(D, D), vec_spec(D),                       # proj
            vec_spec(D), vec_spec(D),                          # ln2 gamma/beta
            mat_spec(D, Dm), vec_spec(Dm),                     # fc1
            mat_spec(Dm, D), vec_spec(D),                      # fc2
        ],
        out_specs=pl.BlockSpec((1, N, D), lambda b, d: (b, 0, 0)),  # resident over depth
        compiler_params=pltpu.CompilerParams(
            dimension_semantics=("parallel", "arbitrary")),
    )(tok, pos,
      blk["ln1_g"], blk["ln1_b"], blk["qkv_w"], blk["qkv_b"],
      blk["proj_w"], blk["proj_b"], blk["ln2_g"], blk["ln2_b"],
      blk["fc1_w"], blk["fc1_b"], blk["fc2_w"], blk["fc2_b"])


# ----------------------------- fused head: final LN + pool + ClassBlock ------------------------------


def _head_kernel(tok_ref, ng_ref, nb_ref, w1_ref, b1_ref,
                 bng_ref, bnb_ref, bnm_ref, bnv_ref, w2_ref, b2_ref,
                 f_ref, logit_ref, *, ln_eps, bn_eps):
    tok = tok_ref[...]                                          # (B, N, D) f32
    x = _layernorm(tok, ng_ref[...], nb_ref[...], ln_eps)       # final ViT norm
    pooled = jnp.mean(x, axis=1)                                # AdaptiveAvgPool1d(1) over tokens
    f = jnp.dot(pooled.astype(jnp.bfloat16), w1_ref[...],
                preferred_element_type=jnp.float32) + b1_ref[...]
    # BatchNorm1d in eval mode (running statistics); Dropout(p=0.5) is identity in eval.
    f = (f - bnm_ref[...]) * jax.lax.rsqrt(bnv_ref[...] + bn_eps) * bng_ref[...] + bnb_ref[...]
    f_ref[...] = f
    logit_ref[...] = jnp.dot(f.astype(jnp.bfloat16), w2_ref[...],
                             preferred_element_type=jnp.float32) + b2_ref[...]


def classblock_head(tok, p, *, ln_eps=1e-6, bn_eps=1e-5):
    B, N, D = tok.shape
    L = p["cb_w1"].shape[1]
    C = p["cb_w2"].shape[1]
    kern = functools.partial(_head_kernel, ln_eps=ln_eps, bn_eps=bn_eps)
    row = lambda n: pl.BlockSpec((1, n), lambda i: (0, 0))
    f, glogit = pl.pallas_call(
        kern,
        out_shape=(jax.ShapeDtypeStruct((B, L), jnp.float32),
                   jax.ShapeDtypeStruct((B, C), jnp.float32)),
        grid=(1,),
        in_specs=[
            pl.BlockSpec((B, N, D), lambda i: (0, 0, 0)),
            row(D), row(D),
            pl.BlockSpec((D, L), lambda i: (0, 0)), row(L),
            row(L), row(L), row(L), row(L),
            pl.BlockSpec((L, C), lambda i: (0, 0)), row(C),
        ],
        out_specs=(pl.BlockSpec((B, L), lambda i: (0, 0)),
                   pl.BlockSpec((B, C), lambda i: (0, 0))),
        compiler_params=pltpu.CompilerParams(dimension_semantics=("arbitrary",)),
    )(tok,
      p["norm_g"].reshape(1, D), p["norm_b"].reshape(1, D),
      p["cb_w1"], p["cb_b1"].reshape(1, L),
      p["cb_bn_g"].reshape(1, L), p["cb_bn_b"].reshape(1, L),
      p["cb_bn_mean"].reshape(1, L), p["cb_bn_var"].reshape(1, L),
      p["cb_w2"], p["cb_b2"].reshape(1, C))
    return glogit, f


# ----------------------------- model forward ------------------------------


def ft_net_vit_forward(params, x_nchw, cfg):
    B, C, H, W = x_nchw.shape
    p = cfg["patch"]
    D = cfg["embed_dim"]
    nP = (H // p) * (W // p)

    # Patch embedding: Conv2d(kernel=stride=patch) == patchify + matmul.
    x = x_nchw.reshape(B, C, H // p, p, W // p, p)
    x = x.transpose(0, 2, 4, 1, 3, 5).reshape(B * nP, C * p * p)
    patches = linear(x, params["patch_w"], params["patch_b"]).reshape(B, nP, D)

    cls = jnp.broadcast_to(params["cls_token"], (B, 1, D))
    tok = jnp.concatenate([cls, patches], axis=1)             # (B, N, D), N = nP + 1

    # Full transformer stack in one fused, depth-pipelined kernel
    # (pos_embed add, residuals, attention and MLP all fused).
    tok = vit_blocks(tok, params["pos_embed"], params["blocks"],
                     num_heads=cfg["num_heads"])

    # Final LN + AvgPool over tokens + ClassBlock (Linear -> BN(eval) -> Linear), fused.
    glogit, f = classblock_head(tok, params)
    dlogit = None               # use_posture=False
    return [glogit, f, dlogit]  # return_f=True


# ----------------------------- parameter init ------------------------------


def init_params(key, cfg):
    C, p, D = cfg["in_chans"], cfg["patch"], cfg["embed_dim"]
    Dm = cfg["mlp_dim"]
    L, NC = cfg["linear_num"], cfg["class_num"]
    depth = cfg["depth"]
    nP = (cfg["img"] // p) ** 2
    N = nP + 1

    keys = iter(jax.random.split(key, 64))

    def nrm(shape, std):
        return (std * jax.random.normal(next(keys), shape)).astype(jnp.float32)

    bf = jnp.bfloat16
    # Matmul weights are stored in bf16 (MXU inputs, f32 accumulation);
    # biases / LayerNorm / BatchNorm params stay f32.
    params = {
        "patch_w": nrm((C * p * p, D), 0.02).astype(bf),
        "patch_b": jnp.zeros((D,), jnp.float32),
        "cls_token": nrm((1, 1, D), 0.02),
        "pos_embed": nrm((1, N, D), 0.02),
        "norm_g": jnp.ones((D,), jnp.float32),
        "norm_b": jnp.zeros((D,), jnp.float32),
        # ClassBlock: Linear(D, L) [kaiming-ish] -> BatchNorm1d(L) -> Linear(L, class_num) [std=0.001]
        "cb_w1": nrm((D, L), (2.0 / D) ** 0.5).astype(bf),
        "cb_b1": jnp.zeros((L,), jnp.float32),
        "cb_bn_g": jnp.ones((L,), jnp.float32) + nrm((L,), 0.02),
        "cb_bn_b": jnp.zeros((L,), jnp.float32),
        "cb_bn_mean": jnp.zeros((L,), jnp.float32),
        "cb_bn_var": jnp.ones((L,), jnp.float32),
        "cb_w2": nrm((L, NC), 0.001).astype(bf),
        "cb_b2": jnp.zeros((NC,), jnp.float32),
        # Per-block params stacked along a leading depth axis so the depth loop is
        # a pipelined grid dimension (block d+1 weights prefetched during block d).
        "blocks": {
            "ln1_g": jnp.ones((depth, 1, D), jnp.float32),
            "ln1_b": jnp.zeros((depth, 1, D), jnp.float32),
            "qkv_w": nrm((depth, D, 3 * D), 0.02).astype(bf),
            "qkv_b": jnp.zeros((depth, 1, 3 * D), jnp.float32),
            "proj_w": nrm((depth, D, D), 0.02).astype(bf),
            "proj_b": jnp.zeros((depth, 1, D), jnp.float32),
            "ln2_g": jnp.ones((depth, 1, D), jnp.float32),
            "ln2_b": jnp.zeros((depth, 1, D), jnp.float32),
            "fc1_w": nrm((depth, D, Dm), 0.02).astype(bf),
            "fc1_b": jnp.zeros((depth, 1, Dm), jnp.float32),
            "fc2_w": nrm((depth, Dm, D), 0.02).astype(bf),
            "fc2_b": jnp.zeros((depth, 1, D), jnp.float32),
        },
    }
    return params


# ----------------------------- main ------------------------------


if __name__ == "__main__":
    cfg = {
        "img": 32,          # scaled-down ViT (real model: 224)
        "patch": 16,
        "in_chans": 3,
        "embed_dim": 64,    # real model: 768
        "num_heads": 4,     # real model: 12
        "depth": 2,         # real model: 12
        "mlp_dim": 256,     # 4 * embed_dim
        "linear_num": 64,   # real model: 512
        "class_num": 10,
    }
    key = jax.random.PRNGKey(0)
    pkey, xkey = jax.random.split(key)
    params = init_params(pkey, cfg)
    x = jax.random.normal(xkey, (2, cfg["in_chans"], cfg["img"], cfg["img"]), jnp.float32)

    fwd = jax.jit(functools.partial(ft_net_vit_forward, cfg=cfg))
    glogit, f, dlogit = fwd(params, x)
    jax.block_until_ready(glogit)
    jax.block_until_ready(f)

    assert glogit.shape == (2, cfg["class_num"]), glogit.shape
    assert f.shape == (2, cfg["linear_num"]), f.shape
    assert dlogit is None
    assert bool(jnp.all(jnp.isfinite(glogit))) and bool(jnp.all(jnp.isfinite(f)))
    print("KERNEL_OK")
</pallas_src>

<mosaic_0001>
module attributes {stable_mosaic.version = 11 : i64} {
  func.func @_vit_blocks_kernel(%arg0: i32, %arg1: i32, %arg2: memref<1x5x64xf32, #tpu.memory_space<vmem>>, %arg3: memref<1x5x64xf32, #tpu.memory_space<vmem>>, %arg4: memref<1x1x64xf32, #tpu.memory_space<vmem>>, %arg5: memref<1x1x64xf32, #tpu.memory_space<vmem>>, %arg6: memref<1x64x192xbf16, #tpu.memory_space<vmem>>, %arg7: memref<1x1x192xf32, #tpu.memory_space<vmem>>, %arg8: memref<1x64x64xbf16, #tpu.memory_space<vmem>>, %arg9: memref<1x1x64xf32, #tpu.memory_space<vmem>>, %arg10: memref<1x1x64xf32, #tpu.memory_space<vmem>>, %arg11: memref<1x1x64xf32, #tpu.memory_space<vmem>>, %arg12: memref<1x64x256xbf16, #tpu.memory_space<vmem>>, %arg13: memref<1x1x256xf32, #tpu.memory_space<vmem>>, %arg14: memref<1x256x64xbf16, #tpu.memory_space<vmem>>, %arg15: memref<1x1x64xf32, #tpu.memory_space<vmem>>, %arg16: memref<1x5x64xf32, #tpu.memory_space<vmem>>) attributes {dimension_semantics = [#tpu.dimension_semantics<parallel>, #tpu.dimension_semantics<arbitrary>], iteration_bounds = array<i64: 2, 2>, scalar_prefetch = 0 : i64, scratch_operands = 0 : i64, tpu.core_type = #tpu.core_type<tc>, window_params = [{transform_indices = @transform_0, window_bounds = array<i64: 1, 5, 64>}, {pipeline_mode = #tpu.pipeline_mode<synchronous>, transform_indices = @transform_1, window_bounds = array<i64: 1, 5, 64>}, {transform_indices = @transform_2, window_bounds = array<i64: 1, 1, 64>}, {transform_indices = @transform_3, window_bounds = array<i64: 1, 1, 64>}, {transform_indices = @transform_4, window_bounds = array<i64: 1, 64, 192>}, {transform_indices = @transform_5, window_bounds = array<i64: 1, 1, 192>}, {transform_indices = @transform_6, window_bounds = array<i64: 1, 64, 64>}, {transform_indices = @transform_7, window_bounds = array<i64: 1, 1, 64>}, {transform_indices = @transform_8, window_bounds = array<i64: 1, 1, 64>}, {transform_indices = @transform_9, window_bounds = array<i64: 1, 1, 64>}, {transform_indices = @transform_10, window_bounds = array<i64: 1, 64, 256>}, {transform_indices = @transform_11, window_bounds = array<i64: 1, 1, 256>}, {transform_indices = @transform_12, window_bounds = array<i64: 1, 256, 64>}, {transform_indices = @transform_13, window_bounds = array<i64: 1, 1, 64>}, {transform_indices = @transform_14, window_bounds = array<i64: 1, 5, 64>}]} {
    %c0_i32 = arith.constant 0 : i32
    %0 = arith.cmpi eq, %arg1, %c0_i32 : i32
    %1 = arith.extui %0 : i1 to i32
    %c0_i32_0 = arith.constant 0 : i32
    %2 = arith.cmpi ne, %1, %c0_i32_0 : i32
    scf.if %2 {
      %c0_83 = arith.constant 0 : index
      %c0_84 = arith.constant 0 : index
      %c0_85 = arith.constant 0 : index
      %202 = vector.load %arg2[%c0_83, %c0_84, %c0_85] : memref<1x5x64xf32, #tpu.memory_space<vmem>>, vector<1x5x64xf32>
      %203 = vector.shape_cast %202 : vector<1x5x64xf32> to vector<5x64xf32>
      %c0_86 = arith.constant 0 : index
      %c0_87 = arith.constant 0 : index
      %c0_88 = arith.constant 0 : index
      %204 = vector.load %arg3[%c0_86, %c0_87, %c0_88] : memref<1x5x64xf32, #tpu.memory_space<vmem>>, vector<1x5x64xf32>
      %205 = vector.shape_cast %204 : vector<1x5x64xf32> to vector<5x64xf32>
      %206 = arith.addf %203, %205 : vector<5x64xf32>
      %c0_89 = arith.constant 0 : index
      %c0_90 = arith.constant 0 : index
      %c0_91 = arith.constant 0 : index
      %207 = vector.load %arg16[%c0_89, %c0_90, %c0_91] : memref<1x5x64xf32, #tpu.memory_space<vmem>>, vector<1x5x64xf32>
      %208 = vector.shape_cast %207 : vector<1x5x64xf32> to vector<5x64xf32>
      %209 = vector.shape_cast %206 : vector<5x64xf32> to vector<1x5x64xf32>
      tpu.vector_store %arg16[%c0_89, %c0_90, %c0_91], %209 {strides = array<i32>} : memref<1x5x64xf32, #tpu.memory_space<vmem>>, vector<1x5x64xf32>,
    } else {
    }
    %c0 = arith.constant 0 : index
    %c0_1 = arith.constant 0 : index
    %c0_2 = arith.constant 0 : index
    %3 = vector.load %arg16[%c0, %c0_1, %c0_2] : memref<1x5x64xf32, #tpu.memory_space<vmem>>, vector<1x5x64xf32>
    %4 = vector.shape_cast %3 : vector<1x5x64xf32> to vector<5x64xf32>
    %c0_3 = arith.constant 0 : index
    %c0_4 = arith.constant 0 : index
    %c0_5 = arith.constant 0 : index
    %5 = vector.load %arg4[%c0_3, %c0_4, %c0_5] : memref<1x1x64xf32, #tpu.memory_space<vmem>>, vector<1x1x64xf32>
    %6 = vector.shape_cast %5 : vector<1x1x64xf32> to vector<1x64xf32>
    %c0_6 = arith.constant 0 : index
    %c0_7 = arith.constant 0 : index
    %c0_8 = arith.constant 0 : index
    %7 = vector.load %arg5[%c0_6, %c0_7, %c0_8] : memref<1x1x64xf32, #tpu.memory_space<vmem>>, vector<1x1x64xf32>
    %8 = vector.shape_cast %7 : vector<1x1x64xf32> to vector<1x64xf32>
    %cst = arith.constant dense<0.000000e+00> : vector<5xf32>
    %9 = vector.multi_reduction <add>, %4, %cst [1] : vector<5x64xf32> to vector<5xf32>
    %10 = vector.shape_cast %9 : vector<5xf32> to vector<5x1xf32>
    %cst_9 = arith.constant 6.400000e+01 : f32
    %11 = vector.broadcast %cst_9 : f32 to vector<5x1xf32>
    %12 = arith.divf %10, %11 : vector<5x1xf32>
    %13 = vector.broadcast %12 : vector<5x1xf32> to vector<5x64xf32>
    %14 = arith.subf %4, %13 : vector<5x64xf32>
    %15 = arith.mulf %14, %14 : vector<5x64xf32>
    %cst_10 = arith.constant dense<0.000000e+00> : vector<5xf32>
    %16 = vector.multi_reduction <add>, %15, %cst_10 [1] : vector<5x64xf32> to vector<5xf32>
    %17 = vector.shape_cast %16 : vector<5xf32> to vector<5x1xf32>
    %cst_11 = arith.constant 6.400000e+01 : f32
    %18 = vector.broadcast %cst_11 : f32 to vector<5x1xf32>
    %19 = arith.divf %17, %18 : vector<5x1xf32>
    %cst_12 = arith.constant 9.99999997E-7 : f32
    %20 = vector.broadcast %cst_12 : f32 to vector<5x1xf32>
    %21 = arith.addf %19, %20 : vector<5x1xf32>
    %22 = math.rsqrt %21 : vector<5x1xf32>
    %23 = vector.broadcast %22 : vector<5x1xf32> to vector<5x64xf32>
    %24 = arith.mulf %14, %23 : vector<5x64xf32>
    %25 = vector.broadcast %6 : vector<1x64xf32> to vector<5x64xf32>
    %26 = arith.mulf %24, %25 : vector<5x64xf32>
    %27 = vector.broadcast %8 : vector<1x64xf32> to vector<5x64xf32>
    %28 = arith.addf %26, %27 : vector<5x64xf32>
    %29 = arith.truncf %28 : vector<5x64xf32> to vector<5x64xbf16>
    %c0_13 = arith.constant 0 : index
    %c0_14 = arith.constant 0 : index
    %c0_15 = arith.constant 0 : index
    %30 = vector.load %arg6[%c0_13, %c0_14, %c0_15] : memref<1x64x192xbf16, #tpu.memory_space<vmem>>, vector<1x64x192xbf16>
    %31 = vector.shape_cast %30 : vector<1x64x192xbf16> to vector<64x192xbf16>
    %cst_16 = arith.constant dense<0.000000e+00> : vector<5x192xf32>
    %32 = tpu.matmul %29, %31, %cst_16 {dimension_numbers = #tpu.dot_dimension_numbers<[1], [0], [0], [1], [0, 0, 1, 1], [], []>} : vector<5x64xbf16>, vector<64x192xbf16>, vector<5x192xf32> -> vector<5x192xf32>
    %c0_17 = arith.constant 0 : index
    %c0_18 = arith.constant 0 : index
    %c0_19 = arith.constant 0 : index
    %33 = vector.load %arg7[%c0_17, %c0_18, %c0_19] : memref<1x1x192xf32, #tpu.memory_space<vmem>>, vector<1x1x192xf32>
    %34 = vector.shape_cast %33 : vector<1x1x192xf32> to vector<1x192xf32>
    %35 = vector.broadcast %34 : vector<1x192xf32> to vector<5x192xf32>
    %36 = arith.addf %32, %35 : vector<5x192xf32>
    %c0_20 = arith.constant 0 : index
    %c0_21 = arith.constant 0 : index
    %c0_22 = arith.constant 0 : index
    %37 = vector.load %arg8[%c0_20, %c0_21, %c0_22] : memref<1x64x64xbf16, #tpu.memory_space<vmem>>, vector<1x64x64xbf16>
    %38 = vector.shape_cast %37 : vector<1x64x64xbf16> to vector<64x64xbf16>
    %cst_23 = arith.constant 0.000000e+00 : f32
    %39 = vector.broadcast %cst_23 : f32 to vector<5x64xf32>
    %40 = vector.extract_strided_slice %36 {offsets = [0, 0], sizes = [5, 16], strides = [1, 1]} : vector<5x192xf32> to vector<5x16xf32>
    %cst_24 = arith.constant 2.500000e-01 : f32
    %41 = vector.broadcast %cst_24 : f32 to vector<5x16xf32>
    %42 = arith.mulf %40, %41 : vector<5x16xf32>
    %43 = arith.truncf %42 : vector<5x16xf32> to vector<5x16xbf16>
    %44 = vector.extract_strided_slice %36 {offsets = [0, 64], sizes = [5, 16], strides = [1, 1]} : vector<5x192xf32> to vector<5x16xf32>
    %45 = arith.truncf %44 : vector<5x16xf32> to vector<5x16xbf16>
    %46 = vector.extract_strided_slice %36 {offsets = [0, 128], sizes = [5, 16], strides = [1, 1]} : vector<5x192xf32> to vector<5x16xf32>
    %47 = arith.truncf %46 : vector<5x16xf32> to vector<5x16xbf16>
    %cst_25 = arith.constant dense<0.000000e+00> : vector<5x5xf32>
    %48 = tpu.matmul %43, %45, %cst_25 {dimension_numbers = #tpu.dot_dimension_numbers<[1], [1], [0], [0], [0, 0, 1, 0], [], []>} : vector<5x16xbf16>, vector<5x16xbf16>, vector<5x5xf32> -> vector<5x5xf32>
    %cst_26 = arith.constant dense<0xFF800000> : vector<5xf32>
    %49 = vector.multi_reduction <maximumf>, %48, %cst_26 [1] : vector<5x5xf32> to vector<5xf32>
    %50 = vector.shape_cast %49 : vector<5xf32> to vector<5x1xf32>
    %51 = vector.broadcast %50 : vector<5x1xf32> to vector<5x5xf32>
    %52 = arith.subf %48, %51 : vector<5x5xf32>
    %53 = math.exp %52 : vector<5x5xf32>
    %cst_27 = arith.constant dense<0.000000e+00> : vector<5xf32>
    %54 = vector.multi_reduction <add>, %53, %cst_27 [1] : vector<5x5xf32> to vector<5xf32>
    %55 = vector.shape_cast %54 : vector<5xf32> to vector<5x1xf32>
    %56 = tpu.reciprocal %55 {approx = true} : vector<5x1xf32> -> vector<5x1xf32>
    %57 = vector.broadcast %56 : vector<5x1xf32> to vector<5x5xf32>
    %58 = arith.mulf %53, %57 : vector<5x5xf32>
    %59 = arith.truncf %58 : vector<5x5xf32> to vector<5x5xbf16>
    %cst_28 = arith.constant dense<0.000000e+00> : vector<5x16xf32>
    %60 = tpu.matmul %59, %47, %cst_28 {dimension_numbers = #tpu.dot_dimension_numbers<[1], [0], [0], [1], [0, 0, 1, 1], [], []>} : vector<5x5xbf16>, vector<5x16xbf16>, vector<5x16xf32> -> vector<5x16xf32>
    %61 = arith.truncf %60 : vector<5x16xf32> to vector<5x16xbf16>
    %62 = vector.extract_strided_slice %38 {offsets = [0, 0], sizes = [16, 64], strides = [1, 1]} : vector<64x64xbf16> to vector<16x64xbf16>
    %cst_29 = arith.constant dense<0.000000e+00> : vector<5x64xf32>
    %63 = tpu.matmul %61, %62, %cst_29 {dimension_numbers = #tpu.dot_dimension_numbers<[1], [0], [0], [1], [0, 0, 1, 1], [], []>} : vector<5x16xbf16>, vector<16x64xbf16>, vector<5x64xf32> -> vector<5x64xf32>
    %64 = arith.addf %39, %63 : vector<5x64xf32>
    %65 = vector.extract_strided_slice %36 {offsets = [0, 16], sizes = [5, 16], strides = [1, 1]} : vector<5x192xf32> to vector<5x16xf32>
    %cst_30 = arith.constant 2.500000e-01 : f32
    %66 = vector.broadcast %cst_30 : f32 to vector<5x16xf32>
    %67 = arith.mulf %65, %66 : vector<5x16xf32>
    %68 = arith.truncf %67 : vector<5x16xf32> to vector<5x16xbf16>
    %69 = vector.extract_strided_slice %36 {offsets = [0, 80], sizes = [5, 16], strides = [1, 1]} : vector<5x192xf32> to vector<5x16xf32>
    %70 = arith.truncf %69 : vector<5x16xf32> to vector<5x16xbf16>
    %71 = vector.extract_strided_slice %36 {offsets = [0, 144], sizes = [5, 16], strides = [1, 1]} : vector<5x192xf32> to vector<5x16xf32>
    %72 = arith.truncf %71 : vector<5x16xf32> to vector<5x16xbf16>
    %cst_31 = arith.constant dense<0.000000e+00> : vector<5x5xf32>
    %73 = tpu.matmul %68, %70, %cst_31 {dimension_numbers = #tpu.dot_dimension_numbers<[1], [1], [0], [0], [0, 0, 1, 0], [], []>} : vector<5x16xbf16>, vector<5x16xbf16>, vector<5x5xf32> -> vector<5x5xf32>
    %cst_32 = arith.constant dense<0xFF800000> : vector<5xf32>
    %74 = vector.multi_reduction <maximumf>, %73, %cst_32 [1] : vector<5x5xf32> to vector<5xf32>
    %75 = vector.shape_cast %74 : vector<5xf32> to vector<5x1xf32>
    %76 = vector.broadcast %75 : vector<5x1xf32> to vector<5x5xf32>
    %77 = arith.subf %73, %76 : vector<5x5xf32>
    %78 = math.exp %77 : vector<5x5xf32>
    %cst_33 = arith.constant dense<0.000000e+00> : vector<5xf32>
    %79 = vector.multi_reduction <add>, %78, %cst_33 [1] : vector<5x5xf32> to vector<5xf32>
    %80 = vector.shape_cast %79 : vector<5xf32> to vector<5x1xf32>
    %81 = tpu.reciprocal %80 {approx = true} : vector<5x1xf32> -> vector<5x1xf32>
    %82 = vector.broadcast %81 : vector<5x1xf32> to vector<5x5xf32>
    %83 = arith.mulf %78, %82 : vector<5x5xf32>
    %84 = arith.truncf %83 : vector<5x5xf32> to vector<5x5xbf16>
    %cst_34 = arith.constant dense<0.000000e+00> : vector<5x16xf32>
    %85 = tpu.matmul %84, %72, %cst_34 {dimension_numbers = #tpu.dot_dimension_numbers<[1], [0], [0], [1], [0, 0, 1, 1], [], []>} : vector<5x5xbf16>, vector<5x16xbf16>, vector<5x16xf32> -> vector<5x16xf32>
    %86 = arith.truncf %85 : vector<5x16xf32> to vector<5x16xbf16>
    %87 = vector.extract_strided_slice %38 {offsets = [16, 0], sizes = [16, 64], strides = [1, 1]} : vector<64x64xbf16> to vector<16x64xbf16>
    %cst_35 = arith.constant dense<0.000000e+00> : vector<5x64xf32>
    %88 = tpu.matmul %86, %87, %cst_35 {dimension_numbers = #tpu.dot_dimension_numbers<[1], [0], [0], [1], [0, 0, 1, 1], [], []>} : vector<5x16xbf16>, vector<16x64xbf16>, vector<5x64xf32> -> vector<5x64xf32>
    %89 = arith.addf %64, %88 : vector<5x64xf32>
    %90 = vector.extract_strided_slice %36 {offsets = [0, 32], sizes = [5, 16], strides = [1, 1]} : vector<5x192xf32> to vector<5x16xf32>
    %cst_36 = arith.constant 2.500000e-01 : f32
    %91 = vector.broadcast %cst_36 : f32 to vector<5x16xf32>
    %92 = arith.mulf %90, %91 : vector<5x16xf32>
    %93 = arith.truncf %92 : vector<5x16xf32> to vector<5x16xbf16>
    %94 = vector.extract_strided_slice %36 {offsets = [0, 96], sizes = [5, 16], strides = [1, 1]} : vector<5x192xf32> to vector<5x16xf32>
    %95 = arith.truncf %94 : vector<5x16xf32> to vector<5x16xbf16>
    %96 = vector.extract_strided_slice %36 {offsets = [0, 160], sizes = [5, 16], strides = [1, 1]} : vector<5x192xf32> to vector<5x16xf32>
    %97 = arith.truncf %96 : vector<5x16xf32> to vector<5x16xbf16>
    %cst_37 = arith.constant dense<0.000000e+00> : vector<5x5xf32>
    %98 = tpu.matmul %93, %95, %cst_37 {dimension_numbers = #tpu.dot_dimension_numbers<[1], [1], [0], [0], [0, 0, 1, 0], [], []>} : vector<5x16xbf16>, vector<5x16xbf16>, vector<5x5xf32> -> vector<5x5xf32>
    %cst_38 = arith.constant dense<0xFF800000> : vector<5xf32>
    %99 = vector.multi_reduction <maximumf>, %98, %cst_38 [1] : vector<5x5xf32> to vector<5xf32>
    %100 = vector.shape_cast %99 : vector<5xf32> to vector<5x1xf32>
    %101 = vector.broadcast %100 : vector<5x1xf32> to vector<5x5xf32>
    %102 = arith.subf %98, %101 : vector<5x5xf32>
    %103 = math.exp %102 : vector<5x5xf32>
    %cst_39 = arith.constant dense<0.000000e+00> : vector<5xf32>
    %104 = vector.multi_reduction <add>, %103, %cst_39 [1] : vector<5x5xf32> to vector<5xf32>
    %105 = vector.shape_cast %104 : vector<5xf32> to vector<5x1xf32>
    %106 = tpu.reciprocal %105 {approx = true} : vector<5x1xf32> -> vector<5x1xf32>
    %107 = vector.broadcast %106 : vector<5x1xf32> to vector<5x5xf32>
    %108 = arith.mulf %103, %107 : vector<5x5xf32>
    %109 = arith.truncf %108 : vector<5x5xf32> to vector<5x5xbf16>
    %cst_40 = arith.constant dense<0.000000e+00> : vector<5x16xf32>
    %110 = tpu.matmul %109, %97, %cst_40 {dimension_numbers = #tpu.dot_dimension_numbers<[1], [0], [0], [1], [0, 0, 1, 1], [], []>} : vector<5x5xbf16>, vector<5x16xbf16>, vector<5x16xf32> -> vector<5x16xf32>
    %111 = arith.truncf %110 : vector<5x16xf32> to vector<5x16xbf16>
    %112 = vector.extract_strided_slice %38 {offsets = [32, 0], sizes = [16, 64], strides = [1, 1]} : vector<64x64xbf16> to vector<16x64xbf16>
    %cst_41 = arith.constant dense<0.000000e+00> : vector<5x64xf32>
    %113 = tpu.matmul %111, %112, %cst_41 {dimension_numbers = #tpu.dot_dimension_numbers<[1], [0], [0], [1], [0, 0, 1, 1], [], []>} : vector<5x16xbf16>, vector<16x64xbf16>, vector<5x64xf32> -> vector<5x64xf32>
    %114 = arith.addf %89, %113 : vector<5x64xf32>
    %115 = vector.extract_strided_slice %36 {offsets = [0, 48], sizes = [5, 16], strides = [1, 1]} : vector<5x192xf32> to vector<5x16xf32>
    %cst_42 = arith.constant 2.500000e-01 : f32
    %116 = vector.broadcast %cst_42 : f32 to vector<5x16xf32>
    %117 = arith.mulf %115, %116 : vector<5x16xf32>
    %118 = arith.truncf %117 : vector<5x16xf32> to vector<5x16xbf16>
    %119 = vector.extract_strided_slice %36 {offsets = [0, 112], sizes = [5, 16], strides = [1, 1]} : vector<5x192xf32> to vector<5x16xf32>
    %120 = arith.truncf %119 : vector<5x16xf32> to vector<5x16xbf16>
    %121 = vector.extract_strided_slice %36 {offsets = [0, 176], sizes = [5, 16], strides = [1, 1]} : vector<5x192xf32> to vector<5x16xf32>
    %122 = arith.truncf %121 : vector<5x16xf32> to vector<5x16xbf16>
    %cst_43 = arith.constant dense<0.000000e+00> : vector<5x5xf32>
    %123 = tpu.matmul %118, %120, %cst_43 {dimension_numbers = #tpu.dot_dimension_numbers<[1], [1], [0], [0], [0, 0, 1, 0], [], []>} : vector<5x16xbf16>, vector<5x16xbf16>, vector<5x5xf32> -> vector<5x5xf32>
    %cst_44 = arith.constant dense<0xFF800000> : vector<5xf32>
    %124 = vector.multi_reduction <maximumf>, %123, %cst_44 [1] : vector<5x5xf32> to vector<5xf32>
    %125 = vector.shape_cast %124 : vector<5xf32> to vector<5x1xf32>
    %126 = vector.broadcast %125 : vector<5x1xf32> to vector<5x5xf32>
    %127 = arith.subf %123, %126 : vector<5x5xf32>
    %128 = math.exp %127 : vector<5x5xf32>
    %cst_45 = arith.constant dense<0.000000e+00> : vector<5xf32>
    %129 = vector.multi_reduction <add>, %128, %cst_45 [1] : vector<5x5xf32> to vector<5xf32>
    %130 = vector.shape_cast %129 : vector<5xf32> to vector<5x1xf32>
    %131 = tpu.reciprocal %130 {approx = true} : vector<5x1xf32> -> vector<5x1xf32>
    %132 = vector.broadcast %131 : vector<5x1xf32> to vector<5x5xf32>
    %133 = arith.mulf %128, %132 : vector<5x5xf32>
    %134 = arith.truncf %133 : vector<5x5xf32> to vector<5x5xbf16>
    %cst_46 = arith.constant dense<0.000000e+00> : vector<5x16xf32>
    %135 = tpu.matmul %134, %122, %cst_46 {dimension_numbers = #tpu.dot_dimension_numbers<[1], [0], [0], [1], [0, 0, 1, 1], [], []>} : vector<5x5xbf16>, vector<5x16xbf16>, vector<5x16xf32> -> vector<5x16xf32>
    %136 = arith.truncf %135 : vector<5x16xf32> to vector<5x16xbf16>
    %137 = vector.extract_strided_slice %38 {offsets = [48, 0], sizes = [16, 64], strides = [1, 1]} : vector<64x64xbf16> to vector<16x64xbf16>
    %cst_47 = arith.constant dense<0.000000e+00> : vector<5x64xf32>
    %138 = tpu.matmul %136, %137, %cst_47 {dimension_numbers = #tpu.dot_dimension_numbers<[1], [0], [0], [1], [0, 0, 1, 1], [], []>} : vector<5x16xbf16>, vector<16x64xbf16>, vector<5x64xf32> -> vector<5x64xf32>
    %139 = arith.addf %114, %138 : vector<5x64xf32>
    %140 = arith.addf %4, %139 : vector<5x64xf32>
    %c0_48 = arith.constant 0 : index
    %c0_49 = arith.constant 0 : index
    %c0_50 = arith.constant 0 : index
    %141 = vector.load %arg9[%c0_48, %c0_49, %c0_50] : memref<1x1x64xf32, #tpu.memory_space<vmem>>, vector<1x1x64xf32>
    %142 = vector.shape_cast %141 : vector<1x1x64xf32> to vector<1x64xf32>
    %143 = vector.broadcast %142 : vector<1x64xf32> to vector<5x64xf32>
    %144 = arith.addf %140, %143 : vector<5x64xf32>
    %c0_51 = arith.constant 0 : index
    %c0_52 = arith.constant 0 : index
    %c0_53 = arith.constant 0 : index
    %145 = vector.load %arg10[%c0_51, %c0_52, %c0_53] : memref<1x1x64xf32, #tpu.memory_space<vmem>>, vector<1x1x64xf32>
    %146 = vector.shape_cast %145 : vector<1x1x64xf32> to vector<1x64xf32>
    %c0_54 = arith.constant 0 : index
    %c0_55 = arith.constant 0 : index
    %c0_56 = arith.constant 0 : index
    %147 = vector.load %arg11[%c0_54, %c0_55, %c0_56] : memref<1x1x64xf32, #tpu.memory_space<vmem>>, vector<1x1x64xf32>
    %148 = vector.shape_cast %147 : vector<1x1x64xf32> to vector<1x64xf32>
    %cst_57 = arith.constant dense<0.000000e+00> : vector<5xf32>
    %149 = vector.multi_reduction <add>, %144, %cst_57 [1] : vector<5x64xf32> to vector<5xf32>
    %150 = vector.shape_cast %149 : vector<5xf32> to vector<5x1xf32>
    %cst_58 = arith.constant 6.400000e+01 : f32
    %151 = vector.broadcast %cst_58 : f32 to vector<5x1xf32>
    %152 = arith.divf %150, %151 : vector<5x1xf32>
    %153 = vector.broadcast %152 : vector<5x1xf32> to vector<5x64xf32>
    %154 = arith.subf %144, %153 : vector<5x64xf32>
    %155 = arith.mulf %154, %154 : vector<5x64xf32>
    %cst_59 = arith.constant dense<0.000000e+00> : vector<5xf32>
    %156 = vector.multi_reduction <add>, %155, %cst_59 [1] : vector<5x64xf32> to vector<5xf32>
    %157 = vector.shape_cast %156 : vector<5xf32> to vector<5x1xf32>
    %cst_60 = arith.constant 6.400000e+01 : f32
    %158 = vector.broadcast %cst_60 : f32 to vector<5x1xf32>
    %159 = arith.divf %157, %158 : vector<5x1xf32>
    %cst_61 = arith.constant 9.99999997E-7 : f32
    %160 = vector.broadcast %cst_61 : f32 to vector<5x1xf32>
    %161 = arith.addf %159, %160 : vector<5x1xf32>
    %162 = math.rsqrt %161 : vector<5x1xf32>
    %163 = vector.broadcast %162 : vector<5x1xf32> to vector<5x64xf32>
    %164 = arith.mulf %154, %163 : vector<5x64xf32>
    %165 = vector.broadcast %146 : vector<1x64xf32> to vector<5x64xf32>
    %166 = arith.mulf %164, %165 : vector<5x64xf32>
    %167 = vector.broadcast %148 : vector<1x64xf32> to vector<5x64xf32>
    %168 = arith.addf %166, %167 : vector<5x64xf32>
    %169 = arith.truncf %168 : vector<5x64xf32> to vector<5x64xbf16>
    %c0_62 = arith.constant 0 : index
    %c0_63 = arith.constant 0 : index
    %c0_64 = arith.constant 0 : index
    %170 = vector.load %arg12[%c0_62, %c0_63, %c0_64] : memref<1x64x256xbf16, #tpu.memory_space<vmem>>, vector<1x64x256xbf16>
    %171 = vector.shape_cast %170 : vector<1x64x256xbf16> to vector<64x256xbf16>
    %cst_65 = arith.constant dense<0.000000e+00> : vector<5x256xf32>
    %172 = tpu.matmul %169, %171, %cst_65 {dimension_numbers = #tpu.dot_dimension_numbers<[1], [0], [0], [1], [0, 0, 1, 1], [], []>} : vector<5x64xbf16>, vector<64x256xbf16>, vector<5x256xf32> -> vector<5x256xf32>
    %c0_66 = arith.constant 0 : index
    %c0_67 = arith.constant 0 : index
    %c0_68 = arith.constant 0 : index
    %173 = vector.load %arg13[%c0_66, %c0_67, %c0_68] : memref<1x1x256xf32, #tpu.memory_space<vmem>>, vector<1x1x256xf32>
    %174 = vector.shape_cast %173 : vector<1x1x256xf32> to vector<1x256xf32>
    %175 = vector.broadcast %174 : vector<1x256xf32> to vector<5x256xf32>
    %176 = arith.addf %172, %175 : vector<5x256xf32>
    %177 = arith.mulf %176, %176 : vector<5x256xf32>
    %178 = arith.mulf %176, %177 : vector<5x256xf32>
    %cst_69 = arith.constant 4.471500e-02 : f32
    %179 = vector.broadcast %cst_69 : f32 to vector<5x256xf32>
    %180 = arith.mulf %179, %178 : vector<5x256xf32>
    %181 = arith.addf %176, %180 : vector<5x256xf32>
    %cst_70 = arith.constant 0.797884583 : f32
    %182 = vector.broadcast %cst_70 : f32 to vector<5x256xf32>
    %183 = arith.mulf %182, %181 : vector<5x256xf32>
    %184 = math.tanh %183 : vector<5x256xf32>
    %cst_71 = arith.constant 1.000000e+00 : f32
    %185 = vector.broadcast %cst_71 : f32 to vector<5x256xf32>
    %186 = arith.addf %185, %184 : vector<5x256xf32>
    %cst_72 = arith.constant 5.000000e-01 : f32
    %187 = vector.broadcast %cst_72 : f32 to vector<5x256xf32>
    %188 = arith.mulf %187, %186 : vector<5x256xf32>
    %189 = arith.mulf %176, %188 : vector<5x256xf32>
    %190 = arith.truncf %189 : vector<5x256xf32> to vector<5x256xbf16>
    %c0_73 = arith.constant 0 : index
    %c0_74 = arith.constant 0 : index
    %c0_75 = arith.constant 0 : index
    %191 = vector.load %arg14[%c0_73, %c0_74, %c0_75] : memref<1x256x64xbf16, #tpu.memory_space<vmem>>, vector<1x256x64xbf16>
    %192 = vector.shape_cast %191 : vector<1x256x64xbf16> to vector<256x64xbf16>
    %cst_76 = arith.constant dense<0.000000e+00> : vector<5x64xf32>
    %193 = tpu.matmul %190, %192, %cst_76 {dimension_numbers = #tpu.dot_dimension_numbers<[1], [0], [0], [1], [0, 0, 1, 1], [], []>} : vector<5x256xbf16>, vector<256x64xbf16>, vector<5x64xf32> -> vector<5x64xf32>
    %c0_77 = arith.constant 0 : index
    %c0_78 = arith.constant 0 : index
    %c0_79 = arith.constant 0 : index
    %194 = vector.load %arg15[%c0_77, %c0_78, %c0_79] : memref<1x1x64xf32, #tpu.memory_space<vmem>>, vector<1x1x64xf32>
    %195 = vector.shape_cast %194 : vector<1x1x64xf32> to vector<1x64xf32>
    %196 = vector.broadcast %195 : vector<1x64xf32> to vector<5x64xf32>
    %197 = arith.addf %193, %196 : vector<5x64xf32>
    %198 = arith.addf %144, %197 : vector<5x64xf32>
    %c0_80 = arith.constant 0 : index
    %c0_81 = arith.constant 0 : index
    %c0_82 = arith.constant 0 : index
    %199 = vector.load %arg16[%c0_80, %c0_81, %c0_82] : memref<1x5x64xf32, #tpu.memory_space<vmem>>, vector<1x5x64xf32>
    %200 = vector.shape_cast %199 : vector<1x5x64xf32> to vector<5x64xf32>
    %201 = vector.shape_cast %198 : vector<5x64xf32> to vector<1x5x64xf32>
    tpu.vector_store %arg16[%c0_80, %c0_81, %c0_82], %201 {strides = array<i32>} : memref<1x5x64xf32, #tpu.memory_space<vmem>>, vector<1x5x64xf32>,
    return
  }
  func.func @transform_0(%arg0: i32, %arg1: i32) -> (i32, i32, i32) {
    %c0_i32 = arith.constant 0 : i32
    %c0_i32_0 = arith.constant 0 : i32
    %c0_i32_1 = arith.constant 0 : i32
    return %arg0, %c0_i32, %c0_i32_0 : i32, i32, i32
  }
  func.func @transform_1(%arg0: i32, %arg1: i32) -> (i32, i32, i32) {
    %c0_i32 = arith.constant 0 : i32
    %c0_i32_0 = arith.constant 0 : i32
    %c0_i32_1 = arith.constant 0 : i32
    %c0_i32_2 = arith.constant 0 : i32
    return %c0_i32, %c0_i32_0, %c0_i32_1 : i32, i32, i32
  }
  func.func @transform_2(%arg0: i32, %arg1: i32) -> (i32, i32, i32) {
    %c0_i32 = arith.constant 0 : i32
    %c0_i32_0 = arith.constant 0 : i32
    %c0_i32_1 = arith.constant 0 : i32
    return %arg1, %c0_i32, %c0_i32_0 : i32, i32, i32
  }
  func.func @transform_3(%arg0: i32, %arg1: i32) -> (i32, i32, i32) {
    %c0_i32 = arith.constant 0 : i32
    %c0_i32_0 = arith.constant 0 : i32
    %c0_i32_1 = arith.constant 0 : i32
    return %arg1, %c0_i32, %c0_i32_0 : i32, i32, i32
  }
  func.func @transform_4(%arg0: i32, %arg1: i32) -> (i32, i32, i32) {
    %c0_i32 = arith.constant 0 : i32
    %c0_i32_0 = arith.constant 0 : i32
    %c0_i32_1 = arith.constant 0 : i32
    return %arg1, %c0_i32, %c0_i32_0 : i32, i32, i32
  }
  func.func @transform_5(%arg0: i32, %arg1: i32) -> (i32, i32, i32) {
    %c0_i32 = arith.constant 0 : i32
    %c0_i32_0 = arith.constant 0 : i32
    %c0_i32_1 = arith.constant 0 : i32
    return %arg1, %c0_i32, %c0_i32_0 : i32, i32, i32
  }
  func.func @transform_6(%arg0: i32, %arg1: i32) -> (i32, i32, i32) {
    %c0_i32 = arith.constant 0 : i32
    %c0_i32_0 = arith.constant 0 : i32
    %c0_i32_1 = arith.constant 0 : i32
    return %arg1, %c0_i32, %c0_i32_0 : i32, i32, i32
  }
  func.func @transform_7(%arg0: i32, %arg1: i32) -> (i32, i32, i32) {
    %c0_i32 = arith.constant 0 : i32
    %c0_i32_0 = arith.constant 0 : i32
    %c0_i32_1 = arith.constant 0 : i32
    return %arg1, %c0_i32, %c0_i32_0 : i32, i32, i32
  }
  func.func @transform_8(%arg0: i32, %arg1: i32) -> (i32, i32, i32) {
    %c0_i32 = arith.constant 0 : i32
    %c0_i32_0 = arith.constant 0 : i32
    %c0_i32_1 = arith.constant 0 : i32
    return %arg1, %c0_i32, %c0_i32_0 : i32, i32, i32
  }
  func.func @transform_9(%arg0: i32, %arg1: i32) -> (i32, i32, i32) {
    %c0_i32 = arith.constant 0 : i32
    %c0_i32_0 = arith.constant 0 : i32
    %c0_i32_1 = arith.constant 0 : i32
    return %arg1, %c0_i32, %c0_i32_0 : i32, i32, i32
  }
  func.func @transform_10(%arg0: i32, %arg1: i32) -> (i32, i32, i32) {
    %c0_i32 = arith.constant 0 : i32
    %c0_i32_0 = arith.constant 0 : i32
    %c0_i32_1 = arith.constant 0 : i32
    return %arg1, %c0_i32, %c0_i32_0 : i32, i32, i32
  }
  func.func @transform_11(%arg0: i32, %arg1: i32) -> (i32, i32, i32) {
    %c0_i32 = arith.constant 0 : i32
    %c0_i32_0 = arith.constant 0 : i32
    %c0_i32_1 = arith.constant 0 : i32
    return %arg1, %c0_i32, %c0_i32_0 : i32, i32, i32
  }
  func.func @transform_12(%arg0: i32, %arg1: i32) -> (i32, i32, i32) {
    %c0_i32 = arith.constant 0 : i32
    %c0_i32_0 = arith.constant 0 : i32
    %c0_i32_1 = arith.constant 0 : i32
    return %arg1, %c0_i32, %c0_i32_0 : i32, i32, i32
  }
  func.func @transform_13(%arg0: i32, %arg1: i32) -> (i32, i32, i32) {
    %c0_i32 = arith.constant 0 : i32
    %c0_i32_0 = arith.constant 0 : i32
    %c0_i32_1 = arith.constant 0 : i32
    return %arg1, %c0_i32, %c0_i32_0 : i32, i32, i32
  }
  func.func @transform_14(%arg0: i32, %arg1: i32) -> (i32, i32, i32) {
    %c0_i32 = arith.constant 0 : i32
    %c0_i32_0 = arith.constant 0 : i32
    %c0_i32_1 = arith.constant 0 : i32
    return %arg0, %c0_i32, %c0_i32_0 : i32, i32, i32
  }
}

module attributes {stable_mosaic.version = 11 : i64} {
  func.func @_linear_kernel(%arg0: i32, %arg1: memref<8x768xf32, #tpu.memory_space<vmem>>, %arg2: memref<768x64xbf16, #tpu.memory_space<vmem>>, %arg3: memref<1x64xf32, #tpu.memory_space<vmem>>, %arg4: memref<8x64xf32, #tpu.memory_space<vmem>>) attributes {dimension_semantics = [#tpu.dimension_semantics<parallel>], iteration_bounds = array<i64: 1>, scalar_prefetch = 0 : i64, scratch_operands = 0 : i64, tpu.core_type = #tpu.core_type<tc>, window_params = [{transform_indices = @transform_0, window_bounds = array<i64: 8, 768>}, {pipeline_mode = #tpu.pipeline_mode<synchronous>, transform_indices = @transform_1, window_bounds = array<i64: 768, 64>}, {pipeline_mode = #tpu.pipeline_mode<synchronous>, transform_indices = @transform_2, window_bounds = array<i64: 1, 64>}, {transform_indices = @transform_3, window_bounds = array<i64: 8, 64>}]} {
    %c0 = arith.constant 0 : index
    %c0_0 = arith.constant 0 : index
    %0 = vector.load %arg1[%c0, %c0_0] : memref<8x768xf32, #tpu.memory_space<vmem>>, vector<8x768xf32>
    %1 = arith.truncf %0 : vector<8x768xf32> to vector<8x768xbf16>
    %c0_1 = arith.constant 0 : index
    %c0_2 = arith.constant 0 : index
    %2 = vector.load %arg2[%c0_1, %c0_2] : memref<768x64xbf16, #tpu.memory_space<vmem>>, vector<768x64xbf16>
    %cst = arith.constant dense<0.000000e+00> : vector<8x64xf32>
    %3 = tpu.matmul %1, %2, %cst {dimension_numbers = #tpu.dot_dimension_numbers<[1], [0], [0], [1], [0, 0, 1, 1], [], []>} : vector<8x768xbf16>, vector<768x64xbf16>, vector<8x64xf32> -> vector<8x64xf32>
    %c0_3 = arith.constant 0 : index
    %c0_4 = arith.constant 0 : index
    %4 = vector.load %arg3[%c0_3, %c0_4] : memref<1x64xf32, #tpu.memory_space<vmem>>, vector<1x64xf32>
    %5 = vector.broadcast %4 : vector<1x64xf32> to vector<8x64xf32>
    %6 = arith.addf %3, %5 : vector<8x64xf32>
    %c0_5 = arith.constant 0 : index
    %c0_6 = arith.constant 0 : index
    %7 = vector.load %arg4[%c0_5, %c0_6] : memref<8x64xf32, #tpu.memory_space<vmem>>, vector<8x64xf32>
    tpu.vector_store %arg4[%c0_5, %c0_6], %6 {strides = array<i32>} : memref<8x64xf32, #tpu.memory_space<vmem>>, vector<8x64xf32>,
    return
  }
  func.func @transform_0(%arg0: i32) -> (i32, i32) {
    %c0_i32 = arith.constant 0 : i32
    %c0_i32_0 = arith.constant 0 : i32
    return %arg0, %c0_i32 : i32, i32
  }
  func.func @transform_1(%arg0: i32) -> (i32, i32) {
    %c0_i32 = arith.constant 0 : i32
    %c0_i32_0 = arith.constant 0 : i32
    %c0_i32_1 = arith.constant 0 : i32
    return %c0_i32, %c0_i32_0 : i32, i32
  }
  func.func @transform_2(%arg0: i32) -> (i32, i32) {
    %c0_i32 = arith.constant 0 : i32
    %c0_i32_0 = arith.constant 0 : i32
    %c0_i32_1 = arith.constant 0 : i32
    return %c0_i32, %c0_i32_0 : i32, i32
  }
  func.func @transform_3(%arg0: i32) -> (i32, i32) {
    %c0_i32 = arith.constant 0 : i32
    %c0_i32_0 = arith.constant 0 : i32
    return %arg0, %c0_i32 : i32, i32
  }
}

module attributes {stable_mosaic.version = 11 : i64} {
  func.func @_head_kernel(%arg0: i32, %arg1: memref<2x5x64xf32, #tpu.memory_space<vmem>>, %arg2: memref<1x64xf32, #tpu.memory_space<vmem>>, %arg3: memref<1x64xf32, #tpu.memory_space<vmem>>, %arg4: memref<64x64xbf16, #tpu.memory_space<vmem>>, %arg5: memref<1x64xf32, #tpu.memory_space<vmem>>, %arg6: memref<1x64xf32, #tpu.memory_space<vmem>>, %arg7: memref<1x64xf32, #tpu.memory_space<vmem>>, %arg8: memref<1x64xf32, #tpu.memory_space<vmem>>, %arg9: memref<1x64xf32, #tpu.memory_space<vmem>>, %arg10: memref<64x10xbf16, #tpu.memory_space<vmem>>, %arg11: memref<1x10xf32, #tpu.memory_space<vmem>>, %arg12: memref<2x64xf32, #tpu.memory_space<vmem>>, %arg13: memref<2x10xf32, #tpu.memory_space<vmem>>) attributes {dimension_semantics = [#tpu.dimension_semantics<arbitrary>], iteration_bounds = array<i64: 1>, scalar_prefetch = 0 : i64, scratch_operands = 0 : i64, tpu.core_type = #tpu.core_type<tc>, window_params = [{pipeline_mode = #tpu.pipeline_mode<synchronous>, transform_indices = @transform_0, window_bounds = array<i64: 2, 5, 64>}, {pipeline_mode = #tpu.pipeline_mode<synchronous>, transform_indices = @transform_1, window_bounds = array<i64: 1, 64>}, {pipeline_mode = #tpu.pipeline_mode<synchronous>, transform_indices = @transform_2, window_bounds = array<i64: 1, 64>}, {pipeline_mode = #tpu.pipeline_mode<synchronous>, transform_indices = @transform_3, window_bounds = array<i64: 64, 64>}, {pipeline_mode = #tpu.pipeline_mode<synchronous>, transform_indices = @transform_4, window_bounds = array<i64: 1, 64>}, {pipeline_mode = #tpu.pipeline_mode<synchronous>, transform_indices = @transform_5, window_bounds = array<i64: 1, 64>}, {pipeline_mode = #tpu.pipeline_mode<synchronous>, transform_indices = @transform_6, window_bounds = array<i64: 1, 64>}, {pipeline_mode = #tpu.pipeline_mode<synchronous>, transform_indices = @transform_7, window_bounds = array<i64: 1, 64>}, {pipeline_mode = #tpu.pipeline_mode<synchronous>, transform_indices = @transform_8, window_bounds = array<i64: 1, 64>}, {pipeline_mode = #tpu.pipeline_mode<synchronous>, transform_indices = @transform_9, window_bounds = array<i64: 64, 10>}, {pipeline_mode = #tpu.pipeline_mode<synchronous>, transform_indices = @transform_10, window_bounds = array<i64: 1, 10>}, {pipeline_mode = #tpu.pipeline_mode<synchronous>, transform_indices = @transform_11, window_bounds = array<i64: 2, 64>}, {pipeline_mode = #tpu.pipeline_mode<synchronous>, transform_indices = @transform_12, window_bounds = array<i64: 2, 10>}]} {
    %c0 = arith.constant 0 : index
    %c0_0 = arith.constant 0 : index
    %c0_1 = arith.constant 0 : index
    %0 = vector.load %arg1[%c0, %c0_0, %c0_1] : memref<2x5x64xf32, #tpu.memory_space<vmem>>, vector<2x5x64xf32>
    %c0_2 = arith.constant 0 : index
    %c0_3 = arith.constant 0 : index
    %1 = vector.load %arg2[%c0_2, %c0_3] : memref<1x64xf32, #tpu.memory_space<vmem>>, vector<1x64xf32>
    %c0_4 = arith.constant 0 : index
    %c0_5 = arith.constant 0 : index
    %2 = vector.load %arg3[%c0_4, %c0_5] : memref<1x64xf32, #tpu.memory_space<vmem>>, vector<1x64xf32>
    %cst = arith.constant dense<0.000000e+00> : vector<2x5xf32>
    %3 = vector.multi_reduction <add>, %0, %cst [2] : vector<2x5x64xf32> to vector<2x5xf32>
    %4 = vector.shape_cast %3 : vector<2x5xf32> to vector<2x5x1xf32>
    %cst_6 = arith.constant 6.400000e+01 : f32
    %5 = vector.broadcast %cst_6 : f32 to vector<2x5x1xf32>
    %6 = arith.divf %4, %5 : vector<2x5x1xf32>
    %7 = vector.broadcast %6 : vector<2x5x1xf32> to vector<2x5x64xf32>
    %8 = arith.subf %0, %7 : vector<2x5x64xf32>
    %9 = arith.mulf %8, %8 : vector<2x5x64xf32>
    %cst_7 = arith.constant dense<0.000000e+00> : vector<2x5xf32>
    %10 = vector.multi_reduction <add>, %9, %cst_7 [2] : vector<2x5x64xf32> to vector<2x5xf32>
    %11 = vector.shape_cast %10 : vector<2x5xf32> to vector<2x5x1xf32>
    %cst_8 = arith.constant 6.400000e+01 : f32
    %12 = vector.broadcast %cst_8 : f32 to vector<2x5x1xf32>
    %13 = arith.divf %11, %12 : vector<2x5x1xf32>
    %cst_9 = arith.constant 9.99999997E-7 : f32
    %14 = vector.broadcast %cst_9 : f32 to vector<2x5x1xf32>
    %15 = arith.addf %13, %14 : vector<2x5x1xf32>
    %16 = math.rsqrt %15 : vector<2x5x1xf32>
    %17 = vector.broadcast %16 : vector<2x5x1xf32> to vector<2x5x64xf32>
    %18 = arith.mulf %8, %17 : vector<2x5x64xf32>
    %19 = vector.shape_cast %1 : vector<1x64xf32> to vector<1x1x64xf32>
    %20 = vector.broadcast %19 : vector<1x1x64xf32> to vector<2x5x64xf32>
    %21 = arith.mulf %18, %20 : vector<2x5x64xf32>
    %22 = vector.shape_cast %2 : vector<1x64xf32> to vector<1x1x64xf32>
    %23 = vector.broadcast %22 : vector<1x1x64xf32> to vector<2x5x64xf32>
    %24 = arith.addf %21, %23 : vector<2x5x64xf32>
    %cst_10 = arith.constant dense<0.000000e+00> : vector<2x64xf32>
    %25 = vector.multi_reduction <add>, %24, %cst_10 [1] : vector<2x5x64xf32> to vector<2x64xf32>
    %cst_11 = arith.constant 5.000000e+00 : f32
    %26 = vector.broadcast %cst_11 : f32 to vector<2x64xf32>
    %27 = arith.divf %25, %26 : vector<2x64xf32>
    %28 = arith.truncf %27 : vector<2x64xf32> to vector<2x64xbf16>
    %c0_12 = arith.constant 0 : index
    %c0_13 = arith.constant 0 : index
    %29 = vector.load %arg4[%c0_12, %c0_13] : memref<64x64xbf16, #tpu.memory_space<vmem>>, vector<64x64xbf16>
    %cst_14 = arith.constant dense<0.000000e+00> : vector<2x64xf32>
    %30 = tpu.matmul %28, %29, %cst_14 {dimension_numbers = #tpu.dot_dimension_numbers<[1], [0], [0], [1], [0, 0, 1, 1], [], []>} : vector<2x64xbf16>, vector<64x64xbf16>, vector<2x64xf32> -> vector<2x64xf32>
    %c0_15 = arith.constant 0 : index
    %c0_16 = arith.constant 0 : index
    %31 = vector.load %arg5[%c0_15, %c0_16] : memref<1x64xf32, #tpu.memory_space<vmem>>, vector<1x64xf32>
    %32 = vector.broadcast %31 : vector<1x64xf32> to vector<2x64xf32>
    %33 = arith.addf %30, %32 : vector<2x64xf32>
    %c0_17 = arith.constant 0 : index
    %c0_18 = arith.constant 0 : index
    %34 = vector.load %arg8[%c0_17, %c0_18] : memref<1x64xf32, #tpu.memory_space<vmem>>, vector<1x64xf32>
    %35 = vector.broadcast %34 : vector<1x64xf32> to vector<2x64xf32>
    %36 = arith.subf %33, %35 : vector<2x64xf32>
    %c0_19 = arith.constant 0 : index
    %c0_20 = arith.constant 0 : index
    %37 = vector.load %arg9[%c0_19, %c0_20] : memref<1x64xf32, #tpu.memory_space<vmem>>, vector<1x64xf32>
    %cst_21 = arith.constant 9.99999974E-6 : f32
    %38 = vector.broadcast %cst_21 : f32 to vector<1x64xf32>
    %39 = arith.addf %37, %38 : vector<1x64xf32>
    %40 = math.rsqrt %39 : vector<1x64xf32>
    %41 = vector.broadcast %40 : vector<1x64xf32> to vector<2x64xf32>
    %42 = arith.mulf %36, %41 : vector<2x64xf32>
    %c0_22 = arith.constant 0 : index
    %c0_23 = arith.constant 0 : index
    %43 = vector.load %arg6[%c0_22, %c0_23] : memref<1x64xf32, #tpu.memory_space<vmem>>, vector<1x64xf32>
    %44 = vector.broadcast %43 : vector<1x64xf32> to vector<2x64xf32>
    %45 = arith.mulf %42, %44 : vector<2x64xf32>
    %c0_24 = arith.constant 0 : index
    %c0_25 = arith.constant 0 : index
    %46 = vector.load %arg7[%c0_24, %c0_25] : memref<1x64xf32, #tpu.memory_space<vmem>>, vector<1x64xf32>
    %47 = vector.broadcast %46 : vector<1x64xf32> to vector<2x64xf32>
    %48 = arith.addf %45, %47 : vector<2x64xf32>
    %c0_26 = arith.constant 0 : index
    %c0_27 = arith.constant 0 : index
    %49 = vector.load %arg12[%c0_26, %c0_27] : memref<2x64xf32, #tpu.memory_space<vmem>>, vector<2x64xf32>
    tpu.vector_store %arg12[%c0_26, %c0_27], %48 {strides = array<i32>} : memref<2x64xf32, #tpu.memory_space<vmem>>, vector<2x64xf32>,
    %50 = arith.truncf %48 : vector<2x64xf32> to vector<2x64xbf16>
    %c0_28 = arith.constant 0 : index
    %c0_29 = arith.constant 0 : index
    %51 = vector.load %arg10[%c0_28, %c0_29] : memref<64x10xbf16, #tpu.memory_space<vmem>>, vector<64x10xbf16>
    %cst_30 = arith.constant dense<0.000000e+00> : vector<2x10xf32>
    %52 = tpu.matmul %50, %51, %cst_30 {dimension_numbers = #tpu.dot_dimension_numbers<[1], [0], [0], [1], [0, 0, 1, 1], [], []>} : vector<2x64xbf16>, vector<64x10xbf16>, vector<2x10xf32> -> vector<2x10xf32>
    %c0_31 = arith.constant 0 : index
    %c0_32 = arith.constant 0 : index
    %53 = vector.load %arg11[%c0_31, %c0_32] : memref<1x10xf32, #tpu.memory_space<vmem>>, vector<1x10xf32>
    %54 = vector.broadcast %53 : vector<1x10xf32> to vector<2x10xf32>
    %55 = arith.addf %52, %54 : vector<2x10xf32>
    %c0_33 = arith.constant 0 : index
    %c0_34 = arith.constant 0 : index
    %56 = vector.load %arg13[%c0_33, %c0_34] : memref<2x10xf32, #tpu.memory_space<vmem>>, vector<2x10xf32>
    tpu.vector_store %arg13[%c0_33, %c0_34], %55 {strides = array<i32>} : memref<2x10xf32, #tpu.memory_space<vmem>>, vector<2x10xf32>,
    return
  }
  func.func @transform_0(%arg0: i32) -> (i32, i32, i32) {
    %c0_i32 = arith.constant 0 : i32
    %c0_i32_0 = arith.constant 0 : i32
    %c0_i32_1 = arith.constant 0 : i32
    %c0_i32_2 = arith.constant 0 : i32
    return %c0_i32, %c0_i32_0, %c0_i32_1 : i32, i32, i32
  }
  func.func @transform_1(%arg0: i32) -> (i32, i32) {
    %c0_i32 = arith.constant 0 : i32
    %c0_i32_0 = arith.constant 0 : i32
    %c0_i32_1 = arith.constant 0 : i32
    return %c0_i32, %c0_i32_0 : i32, i32
  }
  func.func @transform_2(%arg0: i32) -> (i32, i32) {
    %c0_i32 = arith.constant 0 : i32
    %c0_i32_0 = arith.constant 0 : i32
    %c0_i32_1 = arith.constant 0 : i32
    return %c0_i32, %c0_i32_0 : i32, i32
  }
  func.func @transform_3(%arg0: i32) -> (i32, i32) {
    %c0_i32 = arith.constant 0 : i32
    %c0_i32_0 = arith.constant 0 : i32
    %c0_i32_1 = arith.constant 0 : i32
    return %c0_i32, %c0_i32_0 : i32, i32
  }
  func.func @transform_4(%arg0: i32) -> (i32, i32) {
    %c0_i32 = arith.constant 0 : i32
    %c0_i32_0 = arith.constant 0 : i32
    %c0_i32_1 = arith.constant 0 : i32
    return %c0_i32, %c0_i32_0 : i32, i32
  }
  func.func @transform_5(%arg0: i32) -> (i32, i32) {
    %c0_i32 = arith.constant 0 : i32
    %c0_i32_0 = arith.constant 0 : i32
    %c0_i32_1 = arith.constant 0 : i32
    return %c0_i32, %c0_i32_0 : i32, i32
  }
  func.func @transform_6(%arg0: i32) -> (i32, i32) {
    %c0_i32 = arith.constant 0 : i32
    %c0_i32_0 = arith.constant 0 : i32
    %c0_i32_1 = arith.constant 0 : i32
    return %c0_i32, %c0_i32_0 : i32, i32
  }
  func.func @transform_7(%arg0: i32) -> (i32, i32) {
    %c0_i32 = arith.constant 0 : i32
    %c0_i32_0 = arith.constant 0 : i32
    %c0_i32_1 = arith.constant 0 : i32
    return %c0_i32, %c0_i32_0 : i32, i32
  }
  func.func @transform_8(%arg0: i32) -> (i32, i32) {
    %c0_i32 = arith.constant 0 : i32
    %c0_i32_0 = arith.constant 0 : i32
    %c0_i32_1 = arith.constant 0 : i32
    return %c0_i32, %c0_i32_0 : i32, i32
  }
  func.func @transform_9(%arg0: i32) -> (i32, i32) {
    %c0_i32 = arith.constant 0 : i32
    %c0_i32_0 = arith.constant 0 : i32
    %c0_i32_1 = arith.constant 0 : i32
    return %c0_i32, %c0_i32_0 : i32, i32
  }
  func.func @transform_10(%arg0: i32) -> (i32, i32) {
    %c0_i32 = arith.constant 0 : i32
    %c0_i32_0 = arith.constant 0 : i32
    %c0_i32_1 = arith.constant 0 : i32
    return %c0_i32, %c0_i32_0 : i32, i32
  }
  func.func @transform_11(%arg0: i32) -> (i32, i32) {
    %c0_i32 = arith.constant 0 : i32
    %c0_i32_0 = arith.constant 0 : i32
    %c0_i32_1 = arith.constant 0 : i32
    return %c0_i32, %c0_i32_0 : i32, i32
  }
  func.func @transform_12(%arg0: i32) -> (i32, i32) {
    %c0_i32 = arith.constant 0 : i32
    %c0_i32_0 = arith.constant 0 : i32
    %c0_i32_1 = arith.constant 0 : i32
    return %c0_i32, %c0_i32_0 : i32, i32
  }
}

</mosaic_0001>

<bundles_post_ra>
// kernel: ft_net_vit_forward.3
= control target key start
LH: loop header
LB: loop body
LE: loop exit
PB: predicated region body
PF: predicated region fallthrough
CT: control target
= control target key end

     0   :  { %vm538_vm0 = vcmask 523264   ;;  %s895_s1 = inlined_call_operand.vmem [shape: bf16[768,64], index: 1, kind: input, shape index: {}]   ;;  %s896_s0 = inlined_call_operand.vmem [shape: f32[8,768], index: 0, kind: input, shape index: {}]   ;;  %s897_s2 = inlined_call_operand.vmem [shape: f32[1,64], index: 2, kind: input, shape index: {}]   ;;  %s898_s3 = inlined_call_operand.vmem [shape: f32[8,64], index: 3, kind: output, shape index: {}]  }
   0x1   :  { %v659_v0 = vld [vmem:[%s895_s1 + $0x40] sm:$0xff]   ;;  %v663_v4 = vld [vmem:[%s895_s1 + $0x48] sm:$0xff]   ;;  %v667_v8 = vld [vmem:[%s895_s1 + $0x50] sm:$0xff]  }
   0x2   :  { %v660_v1 = vld [vmem:[%s895_s1] sm:$0xff]   ;;  %593 = vmatprep.subr.bf16.mxu0 %v659_v0  ;;  %v664_v5 = vld [vmem:[%s895_s1 + $0x8] sm:$0xff]   ;;  %v668_v9 = vld [vmem:[%s895_s1 + $0x10] sm:$0xff]  }
   0x3   :  { %v661_v2 = vld [vmem:[%s895_s1 + $0xc0] sm:$0xff]   ;;  %594 = vmatpush3.bf16.msra.mxu0 %v660_v1  ;;  %v665_v6 = vld [vmem:[%s895_s1 + $0xc8] sm:$0xff]   ;;  %v669_v10 = vld [vmem:[%s895_s1 + $0xd0] sm:$0xff]  }
   0x4   :  { %v662_v3 = vld [vmem:[%s895_s1 + $0x80] sm:$0xff]   ;;  %615 = vmatprep.subr.bf16.mxu1 %v661_v2  ;;  %595 = vmatprep.subr.bf16.mxu0 %v663_v4  ;;  %v666_v7 = vld [vmem:[%s895_s1 + $0x88] sm:$0xff]   ;;  %v670_v11 = vld [vmem:[%s895_s1 + $0x90] sm:$0xff]  }
   0x5   :  { %616 = vmatpush3.bf16.msra.mxu1 %v662_v3  ;;  %v671_v12 = vld [vmem:[%s895_s1 + $0x58] sm:$0xff]   ;;  %v675_v16 = vld [vmem:[%s895_s1 + $0x60] sm:$0xff]   ;;  %v679_v20 = vld [vmem:[%s895_s1 + $0x68] sm:$0xff]  }
   0x6   :  { %617 = vmatprep.subr.bf16.mxu1 %v665_v6  ;;  %v672_v13 = vld [vmem:[%s895_s1 + $0x18] sm:$0xff]   ;;  %v676_v17 = vld [vmem:[%s895_s1 + $0x20] sm:$0xff]   ;;  %v680_v21 = vld [vmem:[%s895_s1 + $0x28] sm:$0xff]  }
   0x7   :  { %596 = vmatpush3.bf16.msra.mxu0 %v664_v5  ;;  %v673_v14 = vld [vmem:[%s895_s1 + $0xd8] sm:$0xff]   ;;  %v677_v18 = vld [vmem:[%s895_s1 + $0xe0] sm:$0xff]   ;;  %v681_v22 = vld [vmem:[%s895_s1 + $0xe8] sm:$0xff]  }
   0x8   :  { %597 = vmatprep.subr.bf16.mxu0 %v667_v8  ;;  %v674_v15 = vld [vmem:[%s895_s1 + $0x98] sm:$0xff]   ;;  %v678_v19 = vld [vmem:[%s895_s1 + $0xa0] sm:$0xff]   ;;  %v682_v23 = vld [vmem:[%s895_s1 + $0xa8] sm:$0xff]  }
   0x9   :  { %618 = vmatpush3.bf16.msra.mxu1 %v666_v7  ;;  %v683_v24 = vld [vmem:[%s895_s1 + $0x70] sm:$0xff]   ;;  %v687_v28 = vld [vmem:[%s895_s1 + $0x78] sm:$0xff]   ;;  %v16_v31 = vld [vmem:[%s896_s0 + $0x8] sm:$0xff] }
   0xa   :  { %619 = vmatprep.subr.bf16.mxu1 %v669_v10  ;;  %v684_v25 = vld [vmem:[%s895_s1 + $0x30] sm:$0xff]   ;;  %v688_v29 = vld [vmem:[%s895_s1 + $0x38] sm:$0xff]   ;;  %v22_v32 = vpack.c.bf16 %v16_v31, %v16_v31  ;;  %v15_v34 = vld [vmem:[%s896_s0] sm:$0xff] }
   0xb   :  { %598 = vmatpush3.bf16.msra.mxu0 %v668_v9  ;;  %v685_v26 = vld [vmem:[%s895_s1 + $0xf0] sm:$0xff]   ;;  %v689_v30 = vld [vmem:[%s895_s1 + $0xf8] sm:$0xff]   ;;  %v21_v35 = vpack.c.bf16 %v15_v34, %v15_v34  ;;  %v691_v36 = vld [vmem:[%s895_s1 + $0x140] sm:$0xff]  }
   0xc   :  { %599 = vmatprep.subr.bf16.mxu0 %v671_v12  ;;  %v686_v27 = vld [vmem:[%s895_s1 + $0xb0] sm:$0xff]   ;;  %v690_v33 = vld [vmem:[%s895_s1 + $0xb8] sm:$0xff]   ;;  %450 = vmatprep.mubr.bf16.mxu0 %v22_v32  ;;  %v692_v39 = vld [vmem:[%s895_s1 + $0x100] sm:$0xff]  }
   0xd   :  { %620 = vmatpush3.bf16.msra.mxu1 %v670_v11  ;;  %v18_v37 = vld [vmem:[%s896_s0 + $0x18] sm:$0xff]  ;;  %v17_v40 = vld [vmem:[%s896_s0 + $0x10] sm:$0xff]  ;;  %v693_v42 = vld [vmem:[%s895_s1 + $0x148] sm:$0xff]  }
   0xe   :  { %621 = vmatprep.subr.bf16.mxu1 %v673_v14  ;;  %v24_v38 = vpack.c.bf16 %v18_v37, %v18_v37  ;;  %v23_v41 = vpack.c.bf16 %v17_v40, %v17_v40  ;;  %v694_v43 = vld [vmem:[%s895_s1 + $0x108] sm:$0xff]   ;;  %v695_v44 = vld [vmem:[%s895_s1 + $0x150] sm:$0xff]   ;;  %v697_v46 = vld [vmem:[%s895_s1 + $0x158] sm:$0xff]  }
   0xf   :  { %600 = vmatpush3.bf16.msra.mxu0 %v672_v13  ;;  %v696_v45 = vld [vmem:[%s895_s1 + $0x110] sm:$0xff]   ;;  %v698_v47 = vld [vmem:[%s895_s1 + $0x118] sm:$0xff]   ;;  %v699_v48 = vld [vmem:[%s895_s1 + $0x160] sm:$0xff]  }
  0x10   :  { %601 = vmatprep.subr.bf16.mxu0 %v675_v16  ;;  %490 = vmatprep.mubr.bf16.mxu1 %v24_v38  ;;  %v700_v49 = vld [vmem:[%s895_s1 + $0x120] sm:$0xff]   ;;  %v701_v50 = vld [vmem:[%s895_s1 + $0x168] sm:$0xff]   ;;  %v703_v54 = vld [vmem:[%s895_s1 + $0x170] sm:$0xff]  }
  0x11   :  { %622 = vmatpush3.bf16.msra.mxu1 %v674_v15  ;;  %v20_v51 = vld [vmem:[%s896_s0 + $0x28] sm:$0xff]  ;;  %v704_v55 = vld [vmem:[%s895_s1 + $0x130] sm:$0xff]   ;;  %v705_v56 = vld [vmem:[%s895_s1 + $0x178] sm:$0xff]  }
  0x12   :  { %623 = vmatprep.subr.bf16.mxu1 %v677_v18  ;;  %v26_v52 = vpack.c.bf16 %v20_v51, %v20_v51  ;;  %v702_v53 = vld [vmem:[%s895_s1 + $0x128] sm:$0xff]   ;;  %v706_v57 = vld [vmem:[%s895_s1 + $0x138] sm:$0xff]   ;;  %v19_v58 = vld [vmem:[%s896_s0 + $0x20] sm:$0xff] }
  0x13   :  { %602 = vmatpush3.bf16.msra.mxu0 %v676_v17  ;;  %v25_v59 = vpack.c.bf16 %v19_v58, %v19_v58  ;;  %v544_v61 = vld [vmem:[%s897_s2] ss:$0 sm:$0xff] }
  0x14   :  { %603 = vmatprep.subr.bf16.mxu0 %v679_v20 }
  0x15   :  { %624 = vmatpush3.bf16.msra.mxu1 %v678_v19 }
  0x16   :  { %625 = vmatprep.subr.bf16.mxu1 %v681_v22 }
  0x17   :  { %604 = vmatpush3.bf16.msra.mxu0 %v680_v21 }
  0x18   :  { %605 = vmatprep.subr.bf16.mxu0 %v683_v24 }
  0x19   :  { %626 = vmatpush3.bf16.msra.mxu1 %v682_v23 }
  0x1a   :  { %627 = vmatprep.subr.bf16.mxu1 %v685_v26 }
  0x1b   :  { %606 = vmatpush3.bf16.msra.mxu0 %v684_v25 }
  0x1c   :  { %607 = vmatprep.subr.bf16.mxu0 %v687_v28 }
  0x1d   :  { %628 = vmatpush3.bf16.msra.mxu1 %v686_v27 }
  0x1e   :  { %629 = vmatprep.subr.bf16.mxu1 %v689_v30 }
  0x1f   :  { %608 = vmatpush3.bf16.msra.mxu0 %v688_v29 }
  0x20   :  { %637 = vmatprep.subr.bf16.mxu0 %v691_v36 }
  0x21   :  { %630 = vmatpush3.bf16.msra.mxu1 %v690_v33 }
  0x22   :  { %451 = vmatmul.mubr.bf16.vlgmr.msra.gmra.mrb[0].mxu0 %v21_v35 }
  0x23   :  { %638 = vmatpush3.bf16.msra.mxu0 %v692_v39  ;;  %530 = vmatprep.mubr.bf16.mxu0 %v26_v52 }
  0x24   :  { %491 = vmatmul.mubr.bf16.vlgmr.msra.gmra.mrb[0].mxu1 %v23_v41  ;;  %639 = vmatprep.subr.bf16.mxu0 %v693_v42 }
  0x27   :  { %640 = vmatpush3.bf16.msra.mxu0 %v694_v43 }
  0x28   :  { %641 = vmatprep.subr.bf16.mxu0 %v695_v44 }
  0x2b   :  { %642 = vmatpush3.bf16.msra.mxu0 %v696_v45 }
  0x2c   :  { %643 = vmatprep.subr.bf16.mxu0 %v697_v46 }
  0x2f   :  { %644 = vmatpush3.bf16.msra.mxu0 %v698_v47 }
  0x30   :  { %645 = vmatprep.subr.bf16.mxu0 %v699_v48 }
  0x33   :  { %646 = vmatpush3.bf16.msra.mxu0 %v700_v49 }
  0x34   :  { %647 = vmatprep.subr.bf16.mxu0 %v701_v50 }
  0x37   :  { %648 = vmatpush3.bf16.msra.mxu0 %v702_v53 }
  0x38   :  { %649 = vmatprep.subr.bf16.mxu0 %v703_v54 }
  0x3b   :  { %650 = vmatpush3.bf16.msra.mxu0 %v704_v55 }
  0x3c   :  { %651 = vmatprep.subr.bf16.mxu0 %v705_v56 }
  0x3f   :  { %652 = vmatpush3.bf16.msra.mxu0 %v706_v57 }
  0x42   :  { %531 = vmatmul.mubr.bf16.vlgmr.msra.gmra.mrb[4].mxu0 %v25_v59 }
  0xf5   :  { %v609_v60 = vpop.f32.mrb[0].mxu0 }
  0xf6   :  { %v610_v62 = vpop.f32.mrb[1].mxu0 }
  0xf7   :  { %v611_v63 = vadd.f32 %v610_v62, %v609_v60  ;;  %v612_v0 = vpop.f32.mrb[2].mxu0  ;;  %v631_v1 = vpop.f32.mrb[0].mxu1 }
  0xf8   :  { %v613_v2 = vpop.f32.mrb[3].mxu0  ;;  %v632_v4 = vpop.f32.mrb[1].mxu1 }
  0xf9   :  { %v453_v3 = vadd.f32 %v611_v63, %v544_v61  ;;  %v633_v5 = vadd.f32 %v632_v4, %v631_v1  ;;  %v634_v6 = vpop.f32.mrb[2].mxu1 }
  0xfa   :  { %v635_v7 = vpop.f32.mrb[3].mxu1 }
  0xfb   :  { %v493_v8 = vadd.f32 %v633_v5, %v453_v3 }
 0x115   :  { %v653_v9 = vpop.f32.mrb[4].mxu0 }
 0x116   :  { %v654_v10 = vpop.f32.mrb[5].mxu0 }
 0x117   :  { %v655_v11 = vadd.f32 %v654_v10, %v653_v9  ;;  %v656_v12 = vpop.f32.mrb[6].mxu0 }
 0x118   :  { %v657_v13 = vpop.f32.mrb[7].mxu0 }
 0x119   :  { %v533_v14 = vadd.f32 %v655_v11, %v493_v8 }
 0x11b   :  { %539 = vst.msk [vmem:[%s898_s3] sm:$0xff] %vm538_vm0, %v533_v14 }

// kernel: ft_net_vit_forward.5
= control target key start
LH: loop header
LB: loop body
LE: loop exit
PB: predicated region body
PF: predicated region fallthrough
CT: control target
= control target key end

     0   :  { %18 = vsyncpa [#allocation3], 0  ;;  %vm47_vm0 = vcmask 520192   ;;  %s631_s0 = inlined_call_operand.vmem [shape: f32[2,5,64], index: 0, kind: input, shape index: {}]   ;;  %s632_s1 = inlined_call_operand.vmem [shape: f32[1,64], index: 1, kind: input, shape index: {}]   ;;  %s633_s2 = inlined_call_operand.vmem [shape: f32[1,64], index: 2, kind: input, shape index: {}]   ;;  %s634_s3 = inlined_call_operand.vmem [shape: bf16[64,64], index: 3, kind: input, shape index: {}]   ;;  %s635_s4 = inlined_call_operand.vmem [shape: f32[1,64], index: 4, kind: input, shape index: {}]   ;;  %s636_s5 = inlined_call_operand.vmem [shape: f32[1,64], index: 5, kind: input, shape index: {}]   ;;  %s637_s6 = inlined_call_operand.vmem [shape: f32[1,64], index: 6, kind: input, shape index: {}]   ;;  %s638_s7 = inlined_call_operand.vmem [shape: f32[1,64], index: 7, kind: input, shape index: {}]   ;;  %s639_s8 = inlined_call_operand.vmem [shape: f32[1,64], index: 8, kind: input, shape index: {}]   ;;  %s640_s9 = inlined_call_operand.vmem [shape: bf16[64,10], index: 9, kind: input, shape index: {}]   ;;  %s641_s10 = inlined_call_operand.vmem [shape: f32[1,10], index: 10, kind: input, shape index: {}]   ;;  %s642_s11 = inlined_call_operand.hbm [shape: f32[2,64], index: 11, kind: output, shape index: {0}]   ;;  %s643_s12 = inlined_call_operand.hbm [shape: f32[2,10], index: 12, kind: output, shape index: {1}]  }
   0x1   :  { %v43_v0 = vld [vmem:[%s631_s0] sm:$0x1f]  ;;  %v44_v1 = vld [vmem:[%s631_s0 + $0x8] sm:$0x1f] }
   0x2   :  { %v48_v2 = vsel %vm47_vm0, %v43_v0, 0.0  ;;  %v51_v3 = vsel %vm47_vm0, %v44_v1, 0.0 }
   0x3   :  { %49 = vadd.xlane.f32.xlu0 %v48_v2 }
   0x7   :  { %52 = vadd.xlane.f32.xlu0 %v51_v3 }
   0x8   :  { %19 = vsyncpa [#allocation5], 0  ;;  %v404_v14 = vld [vmem:[%s634_s3] sm:$0xff]   ;;  %v466_v15 = vmov 0.0   ;;  %vm467_vm1 = vmmov 0   ;;  %v405_v16 = vld [vmem:[%s634_s3 + $0x8] sm:$0xff]   ;;  %v212_v63 = vlaneseq }
   0x9   :  { %376 = vmatprep.subr.bf16.mxu0 %v466_v15  ;;  %384 = vmatprep.mubr.msk.bf16.mxu0 %vm467_vm1, %v466_v15  ;;  %v406_v17 = vld [vmem:[%s634_s3 + $0x10] sm:$0xff]   ;;  %v407_v18 = vld [vmem:[%s634_s3 + $0x18] sm:$0xff]   ;;  %v408_v19 = vld [vmem:[%s640_s9] sm:$0xff]   ;;  %vm129_vm2 = vcmask 1041409   ;;  %vm156_vm3 = vcmask 523264   ;;  %vm234_vm4 = vcmask 517120  }
   0xa   :  { %377 = vmatpush3.bf16.msra.mxu0 %v404_v14  ;;  %388 = vmatprep.subr.bf16.mxu1 %v466_v15  ;;  %v349_v27 = vld [vmem:[%s632_s1] ss:$0 sm:$0xff]  ;;  %v409_v58 = vld [vmem:[%s640_s9 + $0x8] sm:$0xff]   ;;  %v410_v59 = vld [vmem:[%s640_s9 + $0x10] sm:$0xff]  }
   0xb   :  { %378 = vmatprep.subr.bf16.mxu0 %v466_v15  ;;  %396 = vmatprep.mubr.msk.bf16.mxu1 %vm467_vm1, %v466_v15  ;;  %v350_v29 = vld [vmem:[%s633_s2] ss:$0 sm:$0xff]  ;;  %v411_v60 = vld [vmem:[%s640_s9 + $0x18] sm:$0xff]  }
   0xc   :  { %389 = vmatpush3.bf16.msra.mxu1 %v408_v19  ;;  %v208_v61 = vld [vmem:[%s639_s8] sm:$0x1] }
   0xd   :  { %390 = vmatprep.subr.bf16.mxu1 %v466_v15  ;;  %v209_v62 = vadd.f32 1e-05, %v208_v61  ;;  %v351_v3 = vld [vmem:[%s635_s4] ss:$0 sm:$0xff]  ;;  %s468_s4 = smov [#allocation2]  }
   0xe   :  { %379 = vmatpush3.bf16.msra.mxu0 %v405_v16  ;;  %v359_v14 = vld [vmem:[%s637_s6] ss:$0 sm:$0xff] }
   0xf   :  { %380 = vmatprep.subr.bf16.mxu0 %v466_v15 }
  0x10   :  { %391 = vmatpush3.bf16.msra.mxu1 %v409_v58 }
  0x11   :  { %392 = vmatprep.subr.bf16.mxu1 %v466_v15 }
  0x12   :  { %381 = vmatpush3.bf16.msra.mxu0 %v406_v17 }
  0x13   :  { %382 = vmatprep.subr.bf16.mxu0 %v466_v15 }
  0x14   :  { %393 = vmatpush3.bf16.msra.mxu1 %v410_v59 }
  0x15   :  { %394 = vmatprep.subr.bf16.mxu1 %v466_v15 }
  0x16   :  { %383 = vmatpush3.bf16.msra.mxu0 %v407_v18 }
  0x18   :  { %395 = vmatpush3.bf16.msra.mxu1 %v411_v60 }
  0x90   :  { %v50_v4 = vpop.xlane.xlu0 %49 }
  0x91   :  { %v55_v5 = vmul.f32 0.015625, %v50_v4 }
  0x93   :  { %v57_v6 = vsub.f32 %v43_v0, %v55_v5  ;;  %v213_v0 = vshrl.u32 %v212_v63, 7  ;;  %v357_v5 = vld [vmem:[%s638_s7] ss:$0 sm:$0xff]  ;;  %s327_s7 = sshll.u32 %s468_s4, 4  ;;  %s328_s7 = int_to_ptr.vmem [resolvable:$true] %s327_s7 }
  0x94   :  { %v53_v7 = vpop.xlane.xlu0 %52  ;;  %s418_s30 = scalar_lea.vmem %s328_s7, 32  ;;  %p423_p1 = scmp.lt.s32.totalorder %s328_s7, %s328_s7 }
  0x95   :  { %v56_v8 = vmul.f32 0.015625, %v53_v7  ;;  %v59_v9 = vmul.f32 %v57_v6, %v57_v6  ;;  %p419_p0 = scmp.ne.s32.totalorder %s328_s7, %s418_s30  ;;  %p424_p2 = scmp.lt.s32.totalorder %s418_s30, %s418_s30 }
  0x97   :  { %v58_v10 = vsub.f32 %v44_v1, %v56_v8  ;;  %v61_v11 = vsel %vm47_vm0, %v59_v9, 0.0  ;;  %v214_v1 = vsub.s32 0, %v213_v0  ;;  %p425_p3 = por %p424_p2, %p423_p1 }
  0x98   :  { %62 = vadd.xlane.f32.xlu1 %v61_v11 }
  0x99   :  { %v60_v12 = vmul.f32 %v58_v10, %v58_v10  ;;  %p426_p4 = pnand %p425_p3, %p419_p0 }
  0x9b   :  { %v64_v13 = vsel %vm47_vm0, %v60_v12, 0.0  ;;  %v358_v12 = vld [vmem:[%s636_s5] ss:$0 sm:$0xff] }
  0x9c   :  { %65 = vadd.xlane.f32.xlu1 %v64_v13 }
 0x125   :  { %v63_v20 = vpop.xlane.xlu1 %62 }
 0x126   :  { %v67_v21 = vmul.f32 0.015625, %v63_v20 }
 0x128   :  { %v69_v22 = vadd.f32 1e-06, %v67_v21 }
 0x129   :  { %v66_v23 = vpop.xlane.xlu1 %65 }
 0x12a   :  { %412 = vrsqrt.f32 %v69_v22  ;;  %v68_v24 = vmul.f32 0.015625, %v66_v23 }
 0x12c   :  { %v70_v25 = vadd.f32 1e-06, %v68_v24 }
 0x12e   :  { %414 = vrsqrt.f32 %v70_v25 }
 0x12f   :  { %416 = vrsqrt.f32 %v209_v62 }
 0x134   :  { %v413_v26 = vpop.eup %412 }
 0x135   :  { %v73_v28 = vmul.f32 %v413_v26, %v57_v6 }
 0x137   :  { %v81_v30 = vmul.f32 %v349_v27, %v73_v28 }
 0x138   :  { %v415_v31 = vpop.eup %414 }
 0x139   :  { %v89_v32 = vadd.f32 %v350_v29, %v81_v30  ;;  %v74_v33 = vmul.f32 %v415_v31, %v58_v10  ;;  %v417_v2 = vpop.eup %416 }
 0x13a   :  { %v215_v7 = vrot.slane %v417_v2, %v214_v1 }
 0x13b   :  { %v91_v34 = vsel %vm47_vm0, %v89_v32, 0.0  ;;  %v82_v35 = vmul.f32 %v349_v27, %v74_v33 }
 0x13c   :  { %v92_v36 = vrot.slane %v91_v34, 4 }
 0x13d   :  { %v90_v37 = vadd.f32 %v350_v29, %v82_v35 }
 0x13e   :  { %v93_v38 = vadd.f32 %v92_v36, %v91_v34 }
 0x13f   :  { %v98_v39 = vsel %vm47_vm0, %v90_v37, 0.0 }
 0x140   :  { %v99_v40 = vrot.slane %v98_v39, 4  ;;  %v94_v41 = vrot.slane %v93_v38, 2 }
 0x142   :  { %v95_v42 = vadd.f32 %v94_v41, %v93_v38  ;;  %v100_v43 = vadd.f32 %v99_v40, %v98_v39 }
 0x144   :  { %v96_v44 = vrot.slane %v95_v42, 1  ;;  %v101_v45 = vrot.slane %v100_v43, 2 }
 0x146   :  { %v97_v46 = vadd.f32 %v96_v44, %v95_v42  ;;  %v102_v47 = vadd.f32 %v101_v45, %v100_v43 }
 0x148   :  { %v103_v48 = vrot.slane %v102_v47, 1  ;;  %v106_v49 = vmul.f32 0.2, %v97_v46 }
 0x14a   :  { %v104_v50 = vadd.f32 %v103_v48, %v102_v47  ;;  %v108_v52 = vpack.c.bf16 %v106_v49, %v106_v49 }
 0x14c   :  { %v107_v51 = vmul.f32 0.2, %v104_v50  ;;  %v127_v54 = vunpack.c.l.b16 %v108_v52 }
 0x14e   :  { %v109_v53 = vpack.c.bf16 %v107_v51, %v107_v51 }
 0x150   :  { %v128_v55 = vunpack.c.l.b16 %v109_v53 }
 0x152   :  { %v130_v56 = vsel %vm129_vm2, %v128_v55, %v127_v54 }
 0x153   :  { %v131_v57 = vpack.c.b16 %v130_v56, %v130_v56 }
 0x155   :  { %385 = vmatmul.mubr.msk.bf16.vlgmr.msra.gmra.mrb[0].mxu0 %vm156_vm3, %v131_v57 }
 0x228   :  { %v194_v4 = vpop.f32.mrb[0].mxu0 }
 0x229   :  { %v195_v6 = vadd.f32 %v351_v3, %v194_v4  ;;  %v386_v8 = vpop.f32.mrb[1].mxu0 }
 0x22a   :  { %v197_v9 = vpop.f32.mrb[2].mxu0 }
 0x22b   :  { %v207_v10 = vsub.f32 %v195_v6, %v357_v5  ;;  %v387_v11 = vpop.f32.mrb[3].mxu0 }
 0x22d   :  { %v217_v13 = vmul.f32 %v215_v7, %v207_v10 }
 0x22f   :  { %v225_v15 = vmul.f32 %v358_v12, %v217_v13 }
 0x231   :  { %v233_v16 = vadd.f32 %v359_v14, %v225_v15 }
 0x233   :  { %v236_v17 = vpack.c.bf16 %v233_v16, %v233_v16  ;;  %235 = vst.msk [vmem:[#allocation2] sm:$0x3] %vm234_vm4, %v233_v16 }
 0x235   :  { %397 = vmatmul.mubr.msk.bf16.vlgmr.msra.gmra.mrb[0].mxu1 %vm156_vm3, %v236_v17 }
 0x236   :  { %429 = shalt.err (!%p426_p4)
}
 0x237   :  { %s430_s6 = scalar_lea.hbm %s642_s11, 32 }
 0x238   :  { %p431_p5 = scmp.ne.s32.totalorder %s642_s11, %s430_s6  ;;  %p434_p6 = scmp.lt.u32.totalorder %s430_s6, %s642_s11 }
 0x23a   :  { %p436_p7 = pnand %p434_p6, %p431_p5 }
 0x23c   :  { %439 = shalt.err (!%p436_p7)
}
 0x23d   :  { %330 = dma.vmem_to_hbm [thread:$0]  %s328_s7, 32, %s642_s11, [#allocation3]   ;;  %v360_v18 = vld [vmem:[%s641_s10] ss:$0 sm:$0xff]  ;;  %vm319_vm5 = vcmask 74752  }
 0x23e   :  { %s469_s19 = smov [#allocation4]  }
 0x23f   :  { %s337_s20 = sshll.u32 %s469_s19, 4  ;;  %s338_s20 = int_to_ptr.vmem [resolvable:$true] %s337_s20 }
 0x240   :  { %s440_s21 = scalar_lea.vmem %s338_s20, 32  ;;  %p445_p9 = scmp.lt.s32.totalorder %s338_s20, %s338_s20 }
 0x241   :  { %p441_p8 = scmp.ne.s32.totalorder %s338_s20, %s440_s21  ;;  %p446_p10 = scmp.lt.s32.totalorder %s440_s21, %s440_s21 }
 0x243   :  { %p447_p11 = por %p446_p10, %p445_p9 }
 0x245   :  { %p448_p12 = pnand %p447_p11, %p441_p8 }
 0x308   :  { %v313_v19 = vpop.f32.mrb[0].mxu1 }
 0x309   :  { %v314_v20 = vadd.f32 %v360_v18, %v313_v19  ;;  %v398_v21 = vpop.f32.mrb[1].mxu1 }
 0x30a   :  { %v316_v22 = vpop.f32.mrb[2].mxu1 }
 0x30b   :  { %v399_v23 = vpop.f32.mrb[3].mxu1  ;;  %320 = vst.msk [vmem:[#allocation4] sm:$0x3] %vm319_vm5, %v314_v20 }
 0x30c   :  { %451 = shalt.err (!%p448_p12)
}
 0x30d   :  { %s452_s10 = scalar_lea.hbm %s643_s12, 32 }
 0x30e   :  { %p453_p13 = scmp.ne.s32.totalorder %s643_s12, %s452_s10  ;;  %p456_p0 = scmp.lt.u32.totalorder %s452_s10, %s643_s12 }
 0x310   :  { %p458_p1 = pnand %p456_p0, %p453_p13 }
 0x312   :  { %461 = shalt.err (!%p458_p1)
}
 0x313   :  { %340 = dma.vmem_to_hbm [thread:$0]  %s338_s20, 32, %s643_s12, [#allocation5]  }
 0x314   :  { %462 = dma.done.wait [#allocation3], 32  }
 0x315   :  { %463 = vsyncadd [#allocation3], 4294967264 }
 0x316   :  { %464 = dma.done.wait [#allocation5], 32  }
 0x317   :  { %465 = vsyncadd [#allocation5], 4294967264 }
 0x318   :  { %347 = vsyncpa [#allocation3], 1 }
 0x319   :  { %348 = vsyncpa [#allocation5], 1 }

// kernel: ft_net_vit_forward.4
= control target key start
LH: loop header
LB: loop body
LE: loop exit
PB: predicated region body
PF: predicated region fallthrough
CT: control target
= control target key end

     0   :  { %s2454_s29 = smov 0   ;;  %s2456_s30 = smov 0   ;;  %s2770_s0 = inlined_call_operand.vmem [shape: f32[2,5,64], index: 0, kind: input, shape index: {}]   ;;  %s2771_s1 = inlined_call_operand.vmem [shape: f32[1,5,64], index: 1, kind: input, shape index: {}]   ;;  %s2772_s2 = inlined_call_operand.vmem [shape: f32[2,1,64], index: 2, kind: input, shape index: {}]   ;;  %s2773_s3 = inlined_call_operand.vmem [shape: f32[2,1,64], index: 3, kind: input, shape index: {}]   ;;  %s2774_s4 = inlined_call_operand.vmem [shape: bf16[2,64,192], index: 4, kind: input, shape index: {}]   ;;  %s2775_s5 = inlined_call_operand.vmem [shape: f32[2,1,192], index: 5, kind: input, shape index: {}]   ;;  %s2776_s6 = inlined_call_operand.vmem [shape: bf16[2,64,64], index: 6, kind: input, shape index: {}]   ;;  %s2777_s7 = inlined_call_operand.vmem [shape: f32[2,1,64], index: 7, kind: input, shape index: {}]   ;;  %s2778_s8 = inlined_call_operand.vmem [shape: f32[2,1,64], index: 8, kind: input, shape index: {}]   ;;  %s2779_s9 = inlined_call_operand.vmem [shape: f32[2,1,64], index: 9, kind: input, shape index: {}]   ;;  %s2780_s10 = inlined_call_operand.vmem [shape: bf16[2,64,256], index: 10, kind: input, shape index: {}]   ;;  %s2781_s11 = inlined_call_operand.vmem [shape: f32[2,1,256], index: 11, kind: input, shape index: {}]   ;;  %s2782_s12 = inlined_call_operand.vmem [shape: bf16[2,256,64], index: 12, kind: input, shape index: {}]   ;;  %s2783_s13 = inlined_call_operand.vmem [shape: f32[2,1,64], index: 13, kind: input, shape index: {}]   ;;  %s2784_s14 = inlined_call_operand.vmem [shape: f32[2,5,64], index: 14, kind: output, shape index: {}]  }
   0x1   :  { %2789 = sst [smem:[#allocation8_spill]] %s2770_s0  ;;  %s2458_s15 = smov 0  }
   0x2   :  { %2790 = sst [smem:[#allocation9_spill]] %s2771_s1  ;;  %s2460_s16 = smov 0  }
   0x3   :  { %2791 = sst [smem:[#allocation10_spill]] %s2772_s2  ;;  %s2462_s17 = smov 0  }
   0x4   :  { %2792 = sst [smem:[#allocation11_spill]] %s2773_s3 }
   0x5   :  { %2793 = sst [smem:[#allocation12_spill]] %s2774_s4 }
   0x6   :  { %2794 = sst [smem:[#allocation13_spill]] %s2775_s5 }
   0x7   :  { %2795 = sst [smem:[#allocation14_spill]] %s2784_s14 }
   0x8 LB: > { %2796 = sst [smem:[#allocation2_spill]] %s2350_s29  ;;  %s33_s18 = sadd.s32 1, %s2358_s15  ;;  %s2366_s17 = sphi %s2462_s17, %s24_s17   ;;  %s2362_s16 = sphi %s2460_s16, %s2821_s16   ;;  %s2358_s15 = sphi %s2458_s15, %s2820_s15   ;;  %s2354_s30 = sphi %s2456_s30, %s2819_s30   ;;  %s2350_s29 = sphi %s2454_s29, %s2818_s29  }
   0x9   : > { %2797 = sst [smem:[#allocation3_spill]] %s2358_s15  ;;  %s36_s19 = sadd.s32 1, %s2362_s16 }
   0xa   : > { %2798 = sst [smem:[#allocation4_spill]] %s2362_s16  ;;  %p34_p0 = scmp.ge.s32.totalorder %s33_s18, 2 }
   0xb   : > { %2799 = sst [smem:[#allocation5_spill]] %s2366_s17  ;;  %p2015_p1 = scmp.ge.s32.totalorder %s2366_s17, 1 }
   0xc   : > { %p529_p2 = scmp.lt.s32.totalorder %s2366_s17, 5  ;;  %s2823_s18 = smov (%p34_p0, %s33_s18), 0 }
   0xd   : > { %2800 = sst [smem:[#allocation6_spill]] %s2823_s18  ;;  %s2825_s19 = smov (!%p34_p0, %s36_s19), %s2362_s16 }
   0xe   : > { %p530_p3 = pnand %p2015_p1, %p529_p2  ;;  %p38_p4 = scmp.ge.s32.totalorder %s2825_s19, 2 }
   0xf   : > { %p619_p5 = scmp.lt.s32.totalorder (!%p530_p3), %s2354_s30, 1  ;;  %p623_p6 = scmp.lt.s32.totalorder (!%p530_p3), %s2350_s29, 1 }
  0x10   : > { %s2827_s19 = smov (%p38_p4, %s2825_s19), 0  ;;  %533 = sbr.rel (%p530_p3) target bundleno = 3738 (0xe9a), region = 76 }
  0x11   : > { %2801 = sst [smem:[#allocation7_spill]] %s2827_s19  ;;  %s2802_s0 = sld [smem:[#allocation8_spill]] (!%p530_p3) }
  0x12   : > { %s2805_s4 = sld [smem:[#allocation12_spill]] (!%p530_p3)  ;;  %s2806_s5 = sld [smem:[#allocation13_spill]] (!%p530_p3) }
  0x17   : > { %s2829_s30 = smov (!%p619_p5, %s2354_s30), 1 }
  0x18   : > { %s2488_s20 = scalar_select %p623_p6, %s2350_s29, 1 }
  0x19   : > { %s2016_s21 = sshll.u32 %s2829_s30, 3  ;;  %s2808_s29 = sld [smem:[#allocation2_spill]] }
  0x1a   : > { %s622_s24 = scalar_lea.vmem %s2802_s0, %s2016_s21  ;;  %s2087_s16 = sshll.u32 %s2488_s20, 6 }
  0x1b   : > { %s2505_s1 = scalar_lea.vmem %s2805_s4, %s2087_s16  ;;  %s2019_s30 = sshll.u32 %s2488_s20, 1 }
  0x1c   : > { %s2511_s22 = scalar_lea.vmem %s2806_s5, %s2019_s30  ;;  %s2088_s23 = sshll.u32 %s2488_s20, 5 }
  0x1d   : > { %s2517_s26 = scalar_lea.vmem %s2776_s6, %s2088_s23  ;;  %s2534_s2 = scalar_lea.vmem %s2780_s10, %s2087_s16 }
  0x1e   : > { %s2539_s25 = scalar_lea.vmem %s2781_s11, %s2019_s30  ;;  %s2090_s19 = sshll.u32 %s2488_s20, 7 }
  0x1f   : > { %s668_s27 = scalar_lea.vmem %s2783_s13, %s2488_s20  ;;  %s2549_s3 = scalar_lea.vmem %s2782_s12, %s2090_s19 }
  0x20   : > { %s2807_s5 = sld [smem:[#allocation14_spill]]  ;;  %p2028_p7 = scmp.ne.s32.totalorder %s2808_s29, 0 }
  0x21   : > { %v678_v0 = vld [vmem:[%s622_s24] sm:$0x1f] (!%p2028_p7)  ;;  %s2809_s23 = sld [smem:[#allocation9_spill]] (!%p2028_p7)  ;;  %vm681_vm0 = vcmask (!%p2028_p7), 520192  }
  0x22   : > { %677 = sbr.rel (%p2028_p7) target bundleno = 43 (0x2b), region = 80 }
  0x26   : > { %s2554_s16 = scalar_lea.vmem %s2807_s5, %s2016_s21 }
  0x27   : > { %v679_v1 = vld [vmem:[%s2809_s23] sm:$0x1f] (!%p2028_p7) }
  0x28   : > { %v680_v2 = vadd.f32 (!%p2028_p7), %v679_v1, %v678_v0 }
  0x2a   : > { %682 = vst.msk [vmem:[%s2554_s16] sm:$0x1f] %vm681_vm0, %v680_v2 }
  0x2b PF: > { %vm686_vm1 = vcmask 520192   ;;  %v2260_v10 = vld [vmem:[%s2505_s1 + $0x4] ss:$8 sps:$4 sm:$0xff]   ;;  %v2262_v11 = vld [vmem:[%s2505_s1] ss:$8 sps:$4 sm:$0xff]   ;;  %v2368_v14 = vmov 0   ;;  %v726_v30 = vlaneseq  ;;  %s2814_s18 = scalar_lea.vmem %s2777_s7, %s2488_s20  ;;  %s2816_s19 = scalar_lea.vmem %s2779_s9, %s2488_s20 }
  0x2c   : > { %v2263_v12 = vld [vmem:[%s2505_s1 + $0x14] ss:$8 sps:$4 sm:$0xff]   ;;  %780 = vmatprep.subr.bf16.mxu0 %v2260_v10  ;;  %v2265_v13 = vld [vmem:[%s2505_s1 + $0x10] ss:$8 sps:$4 sm:$0xff]   ;;  %812 = vmatprep.mubr.bf16.mxu0 %v2368_v14  ;;  %v2266_v15 = vld [vmem:[%s2505_s1 + $0x24] ss:$8 sps:$4 sm:$0xff]  }
  0x2d   : > { %781 = vmatpush1.bf16.msra.mxu0 %v2262_v11  ;;  %v2268_v16 = vld [vmem:[%s2505_s1 + $0x20] ss:$8 sps:$4 sm:$0xff]   ;;  %v2269_v17 = vld [vmem:[%s2505_s1 + $0x34] ss:$8 sps:$4 sm:$0xff]   ;;  %v2271_v18 = vld [vmem:[%s2505_s1 + $0x30] ss:$8 sps:$4 sm:$0xff]  }
  0x2e   : > { %782 = vmatprep.subr.bf16.mxu0 %v2263_v12  ;;  %s2810_s24 = sld [smem:[#allocation10_spill]]  ;;  %s2812_s28 = sld [smem:[#allocation11_spill]]  ;;  %vm776_vm2 = vcmask 523264   ;;  %v2369_v29 = vmov 0.0   ;;  %v2590_v31 = vshrl.u32 %v726_v30, 7  ;;  %vm900_vm3 = vcmask 1041408  }
  0x2f   : > { %2143 = vmatprep.subr.bf16.mxu1 %v2369_v29  ;;  %v724_v33 = vld [vmem:[%s2511_s22] sm:$0x3]  ;;  %vm2370_vm4 = vmmov 0   ;;  %vm901_vm5 = vcmask 1042432   ;;  %v2371_v38 = vmov 65535   ;;  %s2372_s1 = smov 64  }
  0x30   : > { %v728_v32 = vsub.s32 0, %v2590_v31  ;;  %v732_v34 = vsub.s32 1, %v2590_v31  ;;  %2145 = vmatprep.mubr.msk.bf16.mxu1 %vm2370_vm4, %v2369_v29  ;;  %v902_v39 = vsel %vm900_vm3, 4294967295, %v2371_v38  ;;  %s2373_s22 = smov 112   ;;  %s2374_s4 = smov 48   ;;  %vm836_vm6 = vcmask 130048  }
  0x31   : > { %v2562_v3 = vld [vmem:[%s2554_s16] sm:$0x1f]  ;;  %783 = vmatpush1.bf16.msra.mxu0 %v2265_v13  ;;  %v2605_v47 = vsel %vm901_vm5, %v902_v39, 0  ;;  %vm883_vm7 = vcmask 36864   ;;  %s2375_s5 = smov 32   ;;  %s2376_s29 = smov 96  }
  0x32   : > { %v687_v4 = vsel %vm686_vm1, %v2562_v3, 0.0  ;;  %784 = vmatprep.subr.bf16.mxu0 %v2266_v15  ;;  %v729_v35 = vrot.slane %v724_v33, %v728_v32  ;;  %v733_v36 = vrot.slane %v724_v33, %v732_v34  ;;  %vm896_vm8 = vcmask 39936   ;;  %s2377_s30 = smov 80   ;;  %s2378_s0 = smov 16  }
  0x33   : > { %688 = vadd.xlane.f32.xlu0 %v687_v4 }
  0x34   : > { %s2811_s17 = scalar_lea.vmem %s2810_s24, %s2488_s20  ;;  %s2813_s15 = scalar_lea.vmem %s2812_s28, %s2488_s20 }
  0x35   : > { %785 = vmatpush1.bf16.msra.mxu0 %v2268_v16  ;;  %v2029_v23 = vld [vmem:[%s2811_s17] ss:$0 sm:$0xff]  ;;  %s2815_s17 = scalar_lea.vmem %s2778_s8, %s2488_s20 }
  0x36   : > { %786 = vmatprep.subr.bf16.mxu0 %v2269_v17  ;;  %v2030_v25 = vld [vmem:[%s2813_s15] ss:$0 sm:$0xff] }
  0x39   : > { %787 = vmatpush1.bf16.msra.mxu0 %v2271_v18 }
  0x3a   : > { %2137 = vmatprep.subr.bf16.mxu0 %v2369_v29 }
  0xc0   : > { %v689_v5 = vpop.xlane.xlu0 %688 }
  0xc1   : > { %v691_v6 = vmul.f32 0.015625, %v689_v5 }
  0xc3   : > { %v692_v7 = vsub.f32 %v2562_v3, %v691_v6 }
  0xc5   : > { %v693_v8 = vmul.f32 %v692_v7, %v692_v7 }
  0xc7   : > { %v694_v9 = vsel %vm686_vm1, %v693_v8, 0.0 }
  0xc8   : > { %695 = vadd.xlane.f32.xlu0 %v694_v9 }
 0x155   : > { %v696_v19 = vpop.xlane.xlu0 %695 }
 0x156   : > { %v697_v20 = vmul.f32 0.015625, %v696_v19 }
 0x158   : > { %v698_v21 = vadd.f32 1e-06, %v697_v20 }
 0x15a   : > { %2304 = vrsqrt.f32 %v698_v21 }
 0x164   : > { %v2305_v22 = vpop.eup %2304 }
 0x165   : > { %v700_v24 = vmul.f32 %v2305_v22, %v692_v7 }
 0x167   : > { %v707_v26 = vmul.f32 %v2029_v23, %v700_v24  ;;  %v2272_v24 = vld [vmem:[%s2517_s26] sm:$0xff]  }
 0x169   : > { %v714_v27 = vadd.f32 %v2030_v25, %v707_v26  ;;  %v2273_v25 = vld [vmem:[%s2517_s26 + $0x8] sm:$0xff]  }
 0x16b   : > { %v715_v28 = vpack.c.bf16 %v714_v27, %v714_v27 }
 0x16d   : > { %2039 = vmatmul.mubr.msk.bf16.vlgmr.msra.gmra.mrb[0].mxu0 %vm776_vm2, %v715_v28 }
 0x16e   : > { %2139 = vmatprep.mubr.msk.bf16.mxu0 %vm2370_vm4, %v2369_v29 }
 0x240   : > { %v814_v37 = vpop.f32.mrb[0].mxu0 }
 0x241   : > { %v815_v40 = vadd.f32 %v814_v37, %v729_v35  ;;  %v816_v41 = vpop.f32.mrb[1].mxu0 }
 0x242   : > { %v817_v42 = vadd.f32 %v816_v41, %v733_v36  ;;  %v818_v43 = vpop.f32.mrb[2].mxu0 }
 0x243   : > { %v829_v44 = vmul.f32 0.25, %v815_v40  ;;  %v2603_v45 = vpack.c.bf16 %v815_v40, %v815_v40  ;;  %v819_v46 = vpop.f32.mrb[3].mxu0 }
 0x244   : > { %v2607_v48 = vpack.c.bf16 %v817_v42, %v817_v42 }
 0x245   : > { %v2609_v49 = vpack.c.bf16 %v829_v44, %v829_v44  ;;  %834 = vrot.lane.b32.xlu1 %v2603_v45, %s2372_s1 }
 0x246   : > { %v905_v50 = vand.u32 %v2605_v47, %v2607_v48 }
 0x247   : > { %949 = vrot.lane.b32.xlu0 %v2609_v49, %s2373_s22 }
 0x248   : > { %2144 = vmatpush3.bf16.msra.mxu1 %v905_v50 }
 0x249   : > { %951 = vrot.lane.b32.xlu1 %v2603_v45, %s2374_s4  ;;  %2155 = vmatprep.subr.bf16.mxu1 %v2369_v29 }
 0x2b7   : > { %v835_v51 = vpop.permute.xlu1 %834 }
 0x2b8   : > { %v841_v52 = vsel %vm836_vm6, %v835_v51, 0 }
 0x2b9   : > { %2138 = vmatpush3.bf16.xpose.msra.mxu0 %v841_v52  ;;  %v950_v55 = vpop.permute.xlu0 %949 }
 0x2ba   : > { %2149 = vmatprep.subr.bf16.mxu0 %v2369_v29 }
 0x2bb   : > { %v952_v53 = vpop.permute.xlu1 %951 }
 0x2bc   : > { %v957_v54 = vsel %vm836_vm6, %v952_v53, 0 }
 0x2c0   : > { %2140 = vmatmul.mubr.msk.bf16.vlgmr.msra.gmra.mrb[4].mxu0 %vm836_vm6, %v2609_v49 }
 0x2c1   : > { %2150 = vmatpush3.bf16.xpose.msra.mxu0 %v957_v54  ;;  %2151 = vmatprep.mubr.msk.bf16.mxu0 %vm2370_vm4, %v2369_v29 }
 0x2c2   : > { %2161 = vmatprep.subr.bf16.mxu0 %v2369_v29 }
 0x2c8   : > { %2152 = vmatmul.mubr.msk.bf16.vlgmr.msra.gmra.mrb[8].mxu0 %vm836_vm6, %v950_v55 }
 0x2c9   : > { %2163 = vmatprep.mubr.msk.bf16.mxu0 %vm2370_vm4, %v2369_v29  ;;  %2162 = vmatpush3.bf16.msra.mxu0 %v2273_v25 }
 0x2ca   : > { %2173 = vmatprep.subr.bf16.mxu0 %v2369_v29 }
 0x393   : > { %v877_v56 = vpop.f32.mrb[4].mxu0 }
 0x394   : > { %v2141_v57 = vpop.f32.mrb[5].mxu0  ;;  %v884_v58 = vsel %vm883_vm7, %v877_v56, -inf }
 0x395   : > { %885 = vmax.xlane.f32.xlu1 %v884_v58  ;;  %v880_v59 = vpop.f32.mrb[6].mxu0 }
 0x396   : > { %v2142_v60 = vpop.f32.mrb[7].mxu0 }
 0x39b   : > { %v993_v61 = vpop.f32.mrb[8].mxu0 }
 0x39c   : > { %v2153_v62 = vpop.f32.mrb[9].mxu0  ;;  %v999_v63 = vsel %vm883_vm7, %v993_v61, -inf }
 0x39d   : > { %1000 = vmax.xlane.f32.xlu0 %v999_v63  ;;  %v996_v0 = vpop.f32.mrb[10].mxu0 }
 0x39e   : > { %v2154_v1 = vpop.f32.mrb[11].mxu0 }
 0x3b3   : > { %1161 = vrot.lane.b32.xlu0 %v2603_v45, %s2375_s5 }
 0x422   : > { %v886_v2 = vpop.xlane.xlu1 %885 }
 0x423   : > { %v887_v4 = vsub.f32 %v877_v56, %v886_v2 }
 0x425   : > { %v888_v5 = vmul.f32 1.442695, %v887_v4 }
 0x427   : > { %2306 = vpow2.f32 %v888_v5 }
 0x42a   : > { %v1001_v6 = vpop.xlane.xlu0 %1000 }
 0x42b   : > { %v1002_v7 = vsub.f32 %v993_v61, %v1001_v6 }
 0x42d   : > { %v1003_v8 = vmul.f32 1.442695, %v1002_v7 }
 0x42e   : > { %v1162_v35 = vpop.permute.xlu0 %1161 }
 0x42f   : > { %2308 = vpow2.f32 %v1003_v8  ;;  %v1167_v40 = vsel %vm836_vm6, %v1162_v35, 0 }
 0x431   : > { %v2307_v9 = vpop.eup %2306 }
 0x432   : > { %v890_v10 = vsel %vm883_vm7, %v2307_v9, 0.0 }
 0x433   : > { %891 = vadd.xlane.f32.xlu1 %v890_v10 }
 0x439   : > { %v2309_v11 = vpop.eup %2308 }
 0x43a   : > { %v1005_v12 = vsel %vm883_vm7, %v2309_v11, 0.0 }
 0x43b   : > { %1006 = vadd.xlane.f32.xlu1 %v1005_v12 }
 0x44c   : > { %1012 = vrot.lane.b32.xlu1 %v2607_v48, %s2373_s22 }
 0x450   : > { %1159 = vrot.lane.b32.xlu1 %v2609_v49, %s2376_s29 }
 0x4c0   : > { %v892_v13 = vpop.xlane.xlu1 %891 }
 0x4c1   : > { %2310 = vrcp.f32 %v892_v13 }
 0x4c8   : > { %v1007_v15 = vpop.xlane.xlu1 %1006 }
 0x4c9   : > { %2312 = vrcp.f32 %v1007_v15 }
 0x4cb   : > { %v2311_v16 = vpop.eup %2310 }
 0x4cc   : > { %v1013_v17 = vpop.permute.xlu1 %1012  ;;  %v894_v18 = vmul.f32 %v2311_v16, %v2307_v9 }
 0x4cd   : > { %v1018_v19 = vand.u32 %v1013_v17, %v2605_v47 }
 0x4ce   : > { %v895_v20 = vpack.c.bf16 %v894_v18, %v894_v18 }
 0x4d0   : > { %2146 = vmatmul.mubr.msk.bf16.vlgmr.msra.gmra.mrb[0].mxu1 %vm896_vm8, %v895_v20  ;;  %v1160_v42 = vpop.permute.xlu1 %1159 }
 0x4d1   : > { %2156 = vmatpush3.bf16.msra.mxu1 %v1018_v19  ;;  %2157 = vmatprep.mubr.msk.bf16.mxu1 %vm2370_vm4, %v2369_v29 }
 0x4d2   : > { %2167 = vmatprep.subr.bf16.mxu1 %v2369_v29 }
 0x4d3   : > { %v2313_v21 = vpop.eup %2312 }
 0x4d4   : > { %v1009_v22 = vmul.f32 %v2313_v21, %v2309_v11 }
 0x4d6   : > { %v1010_v23 = vpack.c.bf16 %v1009_v22, %v1009_v22 }
 0x4d8   : > { %2158 = vmatmul.mubr.msk.bf16.vlgmr.msra.gmra.mrb[4].mxu1 %vm896_vm8, %v1010_v23 }
 0x4d9   : > { %2169 = vmatprep.mubr.msk.bf16.mxu1 %vm2370_vm4, %v2369_v29  ;;  %2168 = vmatpush3.bf16.msra.mxu1 %v2272_v24 }
 0x4da   : > { %2179 = vmatprep.subr.bf16.mxu1 %v2369_v29 }
 0x5a3   : > { %v941_v26 = vpop.f32.mrb[0].mxu1 }
 0x5a4   : > { %v947_v27 = vpack.c.bf16 %v941_v26, %v941_v26  ;;  %v2147_v28 = vpop.f32.mrb[1].mxu1 }
 0x5a5   : > { %v944_v30 = vpop.f32.mrb[2].mxu1  ;;  %v2275_v28 = vld [vmem:[%s2517_s26 + $0x18] sm:$0xff]  }
 0x5a6   : > { %v2148_v33 = vpop.f32.mrb[3].mxu1  ;;  %2170 = vmatmul.mubr.msk.bf16.vlgmr.msra.gmra.mrb[8].mxu1 %vm836_vm6, %v947_v27 }
 0x5a7   : > { %2181 = vmatprep.mubr.msk.bf16.mxu1 %vm2370_vm4, %v2369_v29 }
 0x5ab   : > { %v1054_v36 = vpop.f32.mrb[4].mxu1 }
 0x5ac   : > { %v1060_v37 = vpack.c.bf16 %v1054_v36, %v1054_v36  ;;  %v2159_v38 = vpop.f32.mrb[5].mxu1 }
 0x5ad   : > { %v1057_v39 = vpop.f32.mrb[6].mxu1 }
 0x5ae   : > { %v2160_v41 = vpop.f32.mrb[7].mxu1  ;;  %2164 = vmatmul.mubr.msk.bf16.vlgmr.msra.gmra.mrb[12].mxu0 %vm836_vm6, %v1060_v37 }
 0x5af   : > { %2174 = vmatpush3.bf16.xpose.msra.mxu0 %v1167_v40  ;;  %2175 = vmatprep.mubr.msk.bf16.mxu0 %vm2370_vm4, %v2369_v29 }
 0x5b0   : > { %2185 = vmatprep.subr.bf16.mxu0 %v2369_v29 }
 0x5b6   : > { %2176 = vmatmul.mubr.msk.bf16.vlgmr.msra.gmra.mrb[16].mxu0 %vm836_vm6, %v1160_v42 }
 0x5b7   : > { %2187 = vmatprep.mubr.msk.bf16.mxu0 %vm2370_vm4, %v2369_v29 }
 0x679   : > { %v1153_v43 = vpop.f32.mrb[8].mxu1 }
 0x67a   : > { %v2171_v44 = vpop.f32.mrb[9].mxu1 }
 0x67b   : > { %v1156_v46 = vpop.f32.mrb[10].mxu1 }
 0x67c   : > { %v2172_v50 = vpop.f32.mrb[11].mxu1 }
 0x681   : > { %v1104_v51 = vpop.f32.mrb[12].mxu0 }
 0x682   : > { %v2661_v52 = vadd.f32 %v1153_v43, %v1104_v51  ;;  %v2165_v53 = vpop.f32.mrb[13].mxu0 }
 0x683   : > { %v1107_v54 = vpop.f32.mrb[14].mxu0 }
 0x684   : > { %v2166_v55 = vpop.f32.mrb[15].mxu0 }
 0x689   : > { %v1203_v56 = vpop.f32.mrb[16].mxu0 }
 0x68a   : > { %v2177_v57 = vpop.f32.mrb[17].mxu0  ;;  %v1209_v58 = vsel %vm883_vm7, %v1203_v56, -inf }
 0x68b   : > { %1210 = vmax.xlane.f32.xlu1 %v1209_v58  ;;  %v1206_v59 = vpop.f32.mrb[18].mxu0 }
 0x68c   : > { %v2178_v60 = vpop.f32.mrb[19].mxu0 }
 0x69c   : > { %1221 = vrot.lane.b32.xlu1 %v2607_v48, %s2376_s29 }
 0x6a0   : > { %1320 = vrot.lane.b32.xlu1 %v2609_v49, %s2377_s30 }
 0x718   : > { %v1211_v61 = vpop.xlane.xlu1 %1210 }
 0x719   : > { %v1212_v62 = vsub.f32 %v1203_v56, %v1211_v61 }
 0x71b   : > { %v1213_v63 = vmul.f32 1.442695, %v1212_v62  ;;  %v2276_v62 = vld [vmem:[%s2534_s2] ss:$8 sps:$4 sm:$0xff]  }
 0x71c   : > { %v1222_v0 = vpop.permute.xlu1 %1221 }
 0x71d   : > { %2314 = vpow2.f32 %v1213_v63  ;;  %v1227_v1 = vand.u32 %v1222_v0, %v2605_v47  ;;  %v2281_v63 = vld [vmem:[%s2534_s2 + $0x14] ss:$8 sps:$4 sm:$0xff]   ;;  %v2279_v0 = vld [vmem:[%s2534_s2 + $0x10] ss:$8 sps:$4 sm:$0xff]  }
 0x71f   : > { %2180 = vmatpush3.bf16.msra.mxu1 %v1227_v1  ;;  %v2284_v1 = vld [vmem:[%s2534_s2 + $0x24] ss:$8 sps:$4 sm:$0xff]  }
 0x720   : > { %2191 = vmatprep.subr.bf16.mxu1 %v2369_v29  ;;  %v1321_v10 = vpop.permute.xlu1 %1320 }
 0x727   : > { %v2315_v2 = vpop.eup %2314 }
 0x728   : > { %v1215_v4 = vsel %vm883_vm7, %v2315_v2, 0.0 }
 0x729   : > { %1216 = vadd.xlane.f32.xlu0 %v1215_v4  ;;  %v2285_v4 = vld [vmem:[%s2534_s2 + $0x30] ss:$8 sps:$4 sm:$0xff]  }
 0x73f   : > { %1322 = vrot.lane.b32.xlu0 %v2603_v45, %s2378_s0  ;;  %v2274_v45 = vld [vmem:[%s2517_s26 + $0x10] sm:$0xff]  }
 0x740   : > { %2186 = vmatpush3.bf16.msra.mxu0 %v2274_v45  ;;  %v2058_v45 = vld [vmem:[%s2816_s19] ss:$0 sm:$0xff] }
 0x741   : > { %2197 = vmatprep.subr.bf16.mxu0 %v2369_v29 }
 0x7b6   : > { %v1217_v5 = vpop.xlane.xlu0 %1216 }
 0x7b7   : > { %2316 = vrcp.f32 %v1217_v5  ;;  %v2287_v5 = vld [vmem:[%s2534_s2 + $0x34] ss:$8 sps:$4 sm:$0xff]  }
 0x7ba   : > { %v1323_v7 = vpop.permute.xlu0 %1322 }
 0x7bb   : > { %v1328_v9 = vsel %vm836_vm6, %v1323_v7, 0 }
 0x7c1   : > { %v2317_v49 = vpop.eup %2316 }
 0x7c2   : > { %v1219_v6 = vmul.f32 %v2317_v49, %v2315_v2  ;;  %v2282_v2 = vld [vmem:[%s2534_s2 + $0x20] ss:$8 sps:$4 sm:$0xff]  }
 0x7c4   : > { %v1220_v8 = vpack.c.bf16 %v1219_v6, %v1219_v6 }
 0x7c6   : > { %2182 = vmatmul.mubr.msk.bf16.vlgmr.msra.gmra.mrb[12].mxu1 %vm896_vm8, %v1220_v8 }
 0x7c7   : > { %2192 = vmatpush3.bf16.xpose.msra.mxu1 %v1328_v9  ;;  %2193 = vmatprep.mubr.msk.bf16.mxu1 %vm2370_vm4, %v2369_v29  ;;  %v2057_v9 = vld [vmem:[%s2815_s17] ss:$0 sm:$0xff] }
 0x7c8   : > { %2203 = vmatprep.subr.bf16.mxu1 %v2369_v29 }
 0x7ce   : > { %2194 = vmatmul.mubr.msk.bf16.vlgmr.msra.gmra.mrb[16].mxu1 %vm836_vm6, %v1321_v10 }
 0x7cf   : > { %2205 = vmatprep.mubr.msk.bf16.mxu1 %vm2370_vm4, %v2369_v29  ;;  %2204 = vmatpush3.bf16.msra.mxu1 %v2275_v28  ;;  %v2302_v28 = vld [vmem:[%s2549_s3 + $0x78] sm:$0xff]  }
 0x899   : > { %v1263_v11 = vpop.f32.mrb[12].mxu1 }
 0x89a   : > { %v1269_v12 = vpack.c.bf16 %v1263_v11, %v1263_v11  ;;  %v2183_v13 = vpop.f32.mrb[13].mxu1 }
 0x89b   : > { %v1266_v15 = vpop.f32.mrb[14].mxu1 }
 0x89c   : > { %v2184_v16 = vpop.f32.mrb[15].mxu1  ;;  %2188 = vmatmul.mubr.msk.bf16.vlgmr.msra.gmra.mrb[20].mxu0 %vm836_vm6, %v1269_v12  ;;  %v2288_v15 = vld [vmem:[%s2549_s3 + $0x40] sm:$0xff]  }
 0x89d   : > { %2199 = vmatprep.mubr.msk.bf16.mxu0 %vm2370_vm4, %v2369_v29  ;;  %v2289_v16 = vld [vmem:[%s2549_s3] sm:$0xff]   ;;  %2115 = vmatprep.subr.bf16.mxu1 %v2288_v15 }
 0x8a1   : > { %v1364_v17 = vpop.f32.mrb[16].mxu1 }
 0x8a2   : > { %v2195_v18 = vpop.f32.mrb[17].mxu1  ;;  %v1370_v19 = vsel %vm883_vm7, %v1364_v17, -inf }
 0x8a3   : > { %1371 = vmax.xlane.f32.xlu1 %v1370_v19  ;;  %v1367_v20 = vpop.f32.mrb[18].mxu1  ;;  %v2291_v18 = vld [vmem:[%s2549_s3 + $0x8] sm:$0xff]   ;;  %v2292_v19 = vld [vmem:[%s2549_s3 + $0x50] sm:$0xff]  }
 0x8a4   : > { %v2196_v21 = vpop.f32.mrb[19].mxu1  ;;  %v2293_v20 = vld [vmem:[%s2549_s3 + $0x10] sm:$0xff]  }
 0x8a5   : > { %v2294_v21 = vld [vmem:[%s2549_s3 + $0x58] sm:$0xff]  }
 0x8b4   : > { %1382 = vrot.lane.b32.xlu1 %v2607_v48, %s2377_s30 }
 0x930   : > { %v1372_v22 = vpop.xlane.xlu1 %1371 }
 0x931   : > { %v1373_v23 = vsub.f32 %v1364_v17, %v1372_v22  ;;  %v2290_v17 = vld [vmem:[%s2549_s3 + $0x48] sm:$0xff]   ;;  %v2295_v22 = vld [vmem:[%s2549_s3 + $0x18] sm:$0xff]  }
 0x933   : > { %v1374_v24 = vmul.f32 1.442695, %v1373_v23  ;;  %v2296_v23 = vld [vmem:[%s2549_s3 + $0x60] sm:$0xff]  }
 0x934   : > { %v1383_v25 = vpop.permute.xlu1 %1382 }
 0x935   : > { %2318 = vpow2.f32 %v1374_v24  ;;  %v1388_v26 = vand.u32 %v1383_v25, %v2605_v47  ;;  %v2297_v24 = vld [vmem:[%s2549_s3 + $0x20] sm:$0xff]   ;;  %v2298_v25 = vld [vmem:[%s2549_s3 + $0x68] sm:$0xff]  }
 0x937   : > { %2198 = vmatpush3.bf16.msra.mxu0 %v1388_v26  ;;  %v2299_v26 = vld [vmem:[%s2549_s3 + $0x28] sm:$0xff]  }
 0x93f   : > { %v2319_v29 = vpop.eup %2318 }
 0x940   : > { %v1376_v27 = vsel %vm883_vm7, %v2319_v29, 0.0 }
 0x941   : > { %1377 = vadd.xlane.f32.xlu0 %v1376_v27  ;;  %v2301_v27 = vld [vmem:[%s2549_s3 + $0x30] sm:$0xff]  }
 0x96f   : > { %v1313_v30 = vpop.f32.mrb[20].mxu0 }
 0x970   : > { %v1319_v33 = vadd.f32 %v1313_v30, %v2661_v52  ;;  %v2189_v35 = vpop.f32.mrb[21].mxu0  ;;  %v2056_v52 = vld [vmem:[%s2814_s18] ss:$0 sm:$0xff]  ;;  %v2303_v30 = vld [vmem:[%s2549_s3 + $0x38] sm:$0xff]  }
 0x971   : > { %v1316_v36 = vpop.f32.mrb[22].mxu0 }
 0x972   : > { %v2190_v48 = vpop.f32.mrb[23].mxu0 }
 0x9ce   : > { %v1378_v37 = vpop.xlane.xlu0 %1377 }
 0x9cf   : > { %2320 = vrcp.f32 %v1378_v37 }
 0x9d9   : > { %v2321_v38 = vpop.eup %2320 }
 0x9da   : > { %v1380_v39 = vmul.f32 %v2321_v38, %v2319_v29  ;;  %v2300_v29 = vld [vmem:[%s2549_s3 + $0x70] sm:$0xff]  }
 0x9dc   : > { %v1381_v40 = vpack.c.bf16 %v1380_v39, %v1380_v39 }
 0x9de   : > { %2200 = vmatmul.mubr.msk.bf16.vlgmr.msra.gmra.mrb[24].mxu0 %vm896_vm8, %v1381_v40 }
 0x9df   : > { %1615 = vmatprep.mubr.bf16.mxu0 %v2368_v14 }
 0xab1   : > { %v1424_v47 = vpop.f32.mrb[24].mxu0 }
 0xab2   : > { %v1430_v41 = vpack.c.bf16 %v1424_v47, %v1424_v47  ;;  %v2201_v42 = vpop.f32.mrb[25].mxu0 }
 0xab3   : > { %v1427_v43 = vpop.f32.mrb[26].mxu0 }
 0xab4   : > { %v2202_v44 = vpop.f32.mrb[27].mxu0  ;;  %2206 = vmatmul.mubr.msk.bf16.vlgmr.msra.gmra.mrb[20].mxu1 %vm836_vm6, %v1430_v41 }
 0xab5   : > { %2116 = vmatpush3.bf16.msra.mxu1 %v2289_v16 }
 0xab6   : > { %2117 = vmatprep.subr.bf16.mxu1 %v2290_v17 }
 0xab9   : > { %2118 = vmatpush3.bf16.msra.mxu1 %v2291_v18 }
 0xaba   : > { %2119 = vmatprep.subr.bf16.mxu1 %v2292_v19 }
 0xabd   : > { %2120 = vmatpush3.bf16.msra.mxu1 %v2293_v20 }
 0xabe   : > { %2121 = vmatprep.subr.bf16.mxu1 %v2294_v21 }
 0xac1   : > { %2122 = vmatpush3.bf16.msra.mxu1 %v2295_v22 }
 0xac2   : > { %2123 = vmatprep.subr.bf16.mxu1 %v2296_v23 }
 0xac5   : > { %2124 = vmatpush3.bf16.msra.mxu1 %v2297_v24 }
 0xac6   : > { %2125 = vmatprep.subr.bf16.mxu1 %v2298_v25 }
 0xac9   : > { %2126 = vmatpush3.bf16.msra.mxu1 %v2299_v26 }
 0xaca   : > { %2127 = vmatprep.subr.bf16.mxu1 %v2300_v29 }
 0xacd   : > { %2128 = vmatpush3.bf16.msra.mxu1 %v2301_v27 }
 0xace   : > { %2129 = vmatprep.subr.bf16.mxu1 %v2302_v28 }
 0xad1   : > { %2130 = vmatpush3.bf16.msra.mxu1 %v2303_v30 }
 0xb87   : > { %v1474_v46 = vpop.f32.mrb[20].mxu1 }
 0xb88   : > { %v1480_v50 = vadd.f32 %v1474_v46, %v1319_v33  ;;  %v2207_v51 = vpop.f32.mrb[21].mxu1  ;;  %v1528_v33 = vld [vmem:[%s2539_s25] sm:$0x3] }
 0xb89   : > { %v1477_v53 = vpop.f32.mrb[22].mxu1  ;;  %v1533_v35 = vrot.slane %v1528_v33, %v728_v32  ;;  %v1537_v36 = vrot.slane %v1528_v33, %v732_v34 }
 0xb8a   : > { %v1481_v14 = vadd.f32 %v1480_v50, %v2562_v3  ;;  %v2208_v54 = vpop.f32.mrb[23].mxu1  ;;  %v2278_v3 = vld [vmem:[%s2534_s2 + $0x4] ss:$8 sps:$4 sm:$0xff]  }
 0xb8b   : > { %1583 = vmatprep.subr.bf16.mxu0 %v2278_v3 }
 0xb8c   : > { %v2701_v55 = vadd.f32 %v2056_v52, %v1481_v14  ;;  %1584 = vmatpush1.bf16.msra.mxu0 %v2276_v62  ;;  %v2068_v62 = vld [vmem:[%s668_s27] ss:$0 sm:$0xff] }
 0xb8d   : > { %1585 = vmatprep.subr.bf16.mxu0 %v2281_v63 }
 0xb8e   : > { %v1492_v56 = vsel %vm686_vm1, %v2701_v55, 0.0 }
 0xb8f   : > { %1493 = vadd.xlane.f32.xlu0 %v1492_v56 }
 0xb90   : > { %1586 = vmatpush1.bf16.msra.mxu0 %v2279_v0 }
 0xb91   : > { %1587 = vmatprep.subr.bf16.mxu0 %v2284_v1 }
 0xb94   : > { %1588 = vmatpush1.bf16.msra.mxu0 %v2282_v2 }
 0xb95   : > { %1589 = vmatprep.subr.bf16.mxu0 %v2287_v5 }
 0xb98   : > { %1590 = vmatpush1.bf16.msra.mxu0 %v2285_v4 }
 0xc1c   : > { %v1494_v57 = vpop.xlane.xlu0 %1493 }
 0xc1d   : > { %v1495_v58 = vmul.f32 0.015625, %v1494_v57 }
 0xc1f   : > { %v1496_v59 = vsub.f32 %v2701_v55, %v1495_v58 }
 0xc21   : > { %v1497_v60 = vmul.f32 %v1496_v59, %v1496_v59 }
 0xc23   : > { %v1498_v61 = vsel %vm686_vm1, %v1497_v60, 0.0 }
 0xc24   : > { %1499 = vadd.xlane.f32.xlu0 %v1498_v61 }
 0xcb1   : > { %v1500_v49 = vpop.xlane.xlu0 %1499 }
 0xcb2   : > { %v1501_v6 = vmul.f32 0.015625, %v1500_v49 }
 0xcb4   : > { %v1502_v7 = vadd.f32 1e-06, %v1501_v6 }
 0xcb6   : > { %2322 = vrsqrt.f32 %v1502_v7 }
 0xcc0   : > { %v2323_v8 = vpop.eup %2322 }
 0xcc1   : > { %v1504_v10 = vmul.f32 %v2323_v8, %v1496_v59 }
 0xcc3   : > { %v1511_v11 = vmul.f32 %v2057_v9, %v1504_v10 }
 0xcc5   : > { %v1518_v12 = vadd.f32 %v2058_v45, %v1511_v11 }
 0xcc7   : > { %v1519_v13 = vpack.c.bf16 %v1518_v12, %v1518_v12 }
 0xcc9   : > { %2067 = vmatmul.mubr.msk.bf16.vlgmr.msra.gmra.mrb[28].mxu0 %vm776_vm2, %v1519_v13 }
 0xd9c   : > { %v1617_v48 = vpop.f32.mrb[28].mxu0 }
 0xd9d   : > { %v1618_v37 = vadd.f32 %v1617_v48, %v1533_v35  ;;  %v1619_v38 = vpop.f32.mrb[29].mxu0 }
 0xd9e   : > { %v1620_v39 = vadd.f32 %v1619_v38, %v1537_v36  ;;  %v1621_v40 = vpop.f32.mrb[30].mxu0 }
 0xd9f   : > { %v1624_v47 = vmul.f32 %v1618_v37, %v1618_v37  ;;  %v1622_v41 = vpop.f32.mrb[31].mxu0 }
 0xda0   : > { %v1625_v42 = vmul.f32 %v1620_v39, %v1620_v39 }
 0xda1   : > { %v1626_v43 = vmul.f32 %v1624_v47, %v1618_v37 }
 0xda2   : > { %v1627_v44 = vmul.f32 %v1625_v42, %v1620_v39 }
 0xda3   : > { %v1628_v46 = vmul.f32 0.044715, %v1626_v43 }
 0xda4   : > { %v1629_v50 = vmul.f32 0.044715, %v1627_v44 }
 0xda5   : > { %v1630_v51 = vadd.f32 %v1628_v46, %v1618_v37 }
 0xda6   : > { %v1631_v52 = vadd.f32 %v1629_v50, %v1620_v39 }
 0xda7   : > { %v1632_v53 = vmul.f32 0.7978846, %v1630_v51 }
 0xda8   : > { %v1633_v14 = vmul.f32 0.7978846, %v1631_v52 }
 0xda9   : > { %2324 = vtanh.f32 %v1632_v53 }
 0xdaa   : > { %2326 = vtanh.f32 %v1633_v14 }
 0xdb3   : > { %v2325_v31 = vpop.eup %2324 }
 0xdb4   : > { %v2327_v32 = vpop.eup %2326  ;;  %v1636_v34 = vadd.f32 1.0, %v2325_v31 }
 0xdb5   : > { %v1637_v54 = vadd.f32 1.0, %v2327_v32 }
 0xdb6   : > { %v1638_v56 = vmul.f32 0.5, %v1636_v34 }
 0xdb7   : > { %v1639_v57 = vmul.f32 0.5, %v1637_v54 }
 0xdb8   : > { %v1640_v58 = vmul.f32 %v1638_v56, %v1618_v37 }
 0xdb9   : > { %v1641_v59 = vmul.f32 %v1639_v57, %v1620_v39 }
 0xdba   : > { %v1642_v61 = vpack.c.bf16 %v1640_v58, %v1640_v58 }
 0xdbb   : > { %v1643_v60 = vpack.c.bf16 %v1641_v59, %v1641_v59 }
 0xdbd   : > { %1811 = vmatprep.mubr.bf16.mxu1 %v1643_v60 }
 0xdbe   : > { %1812 = vmatmul.mubr.bf16.vlgmr.msra.gmra.mrb[24].mxu1 %v1642_v61 }
 0xe91   : > { %v2131_v3 = vpop.f32.mrb[24].mxu1 }
 0xe92   : > { %v2132_v63 = vpop.f32.mrb[25].mxu1 }
 0xe93   : > { %v2133_v0 = vadd.f32 %v2132_v63, %v2131_v3  ;;  %v2134_v1 = vpop.f32.mrb[26].mxu1 }
 0xe94   : > { %v2135_v2 = vpop.f32.mrb[27].mxu1 }
 0xe95   : > { %v1814_v4 = vadd.f32 %v2133_v0, %v2068_v62 }
 0xe97   : > { %v1819_v5 = vadd.f32 %v1814_v4, %v2701_v55 }
 0xe99   : > { %1820 = vst.msk [vmem:[%s2554_s16] sm:$0x1f] %vm686_vm1, %v1819_v5 }
 0xe9a PF: > { %s2817_s28 = sld [smem:[#allocation5_spill]]  ;;  %s2818_s29 = sld [smem:[#allocation3_spill]] }
 0xe9b   : > { %s2819_s30 = sld [smem:[#allocation4_spill]]  ;;  %s2820_s15 = sld [smem:[#allocation6_spill]] }
 0xe9c   : > { %s2821_s16 = sld [smem:[#allocation7_spill]] }
 0xea0   : > { %s24_s17 = sadd.s32 1, %s2817_s28  }
 0xea1   : > { %p21_p8 = scmp.ge.s32.totalorder %s24_s17, 6  }
 0xea3   :  { %23 = sbr.rel (!%p21_p8) target bundleno = 8 (0x8), region = 146 }

</bundles_post_ra>
